<compile_context>
chip_gen: v7x
topology: tpu7x:2x2x1
jax: 0.10.0
libtpu: 0.0.40
codegen_flags: <defaults>
</compile_context>

<pallas_src>
import math

import jax
import jax.numpy as jnp
from jax.experimental import pallas as pl
from jax.experimental.pallas import tpu as pltpu

# --- synthetic BERT config (small, deterministic weights) ---
VOCAB = 50
TYPE_VOCAB = 2
MAX_POS = 64
HIDDEN = 32
N_HEADS = 2
HEAD_DIM = HIDDEN // N_HEADS
INTER = 64
N_LAYERS = 2
LN_EPS = 1e-12


# ----------------------------- kernel helpers -----------------------------

def _layernorm(x, gamma, beta):
    """LayerNorm over the last dim (f32 statistics)."""
    mean = jnp.mean(x, axis=-1, keepdims=True)
    xc = x - mean
    var = jnp.mean(xc * xc, axis=-1, keepdims=True)
    return xc * jax.lax.rsqrt(var + LN_EPS) * gamma + beta


def _erf(z):
    # Abramowitz & Stegun 7.1.26 rational approximation, |err| < 1.5e-7:
    # matches HF BERT's exact erf-based GELU at float32 precision.
    p = 0.3275911
    a1, a2, a3, a4, a5 = (0.254829592, -0.284496736, 1.421413741,
                          -1.453152027, 1.061405429)
    az = jnp.abs(z)
    t = 1.0 / (1.0 + p * az)
    poly = t * (a1 + t * (a2 + t * (a3 + t * (a4 + t * a5))))
    y = 1.0 - poly * jnp.exp(-az * az)
    return jnp.where(z >= 0.0, y, -y)


def _gelu_exact(x):
    return 0.5 * x * (1.0 + _erf(x * 0.7071067811865475))


# ------------------------------ fused kernel ------------------------------

def _bert_encoder_kernel(emb_ref, mask_ref, eg_ref, eb_ref,
                         wqkv_ref, bqkv_ref, wo_ref, bo_ref,
                         ln1g_ref, ln1b_ref,
                         wi_ref, bi_ref, wf_ref, bf_ref,
                         ln2g_ref, ln2b_ref,
                         o_ref):
    """One grid step = one batch element; the whole encoder stack is fused."""
    # Embedding LayerNorm (no residual stream -> no zero-array DMA).
    x = _layernorm(emb_ref[0], eg_ref[...], eb_ref[...])          # (S, H)
    mask = mask_ref[0]                                            # (1, S) additive
    scale = 1.0 / math.sqrt(HEAD_DIM)

    for l in range(N_LAYERS):                                     # static unroll
        # --- fused QKV projection: one (H, 3H) matmul ---
        qkv = jnp.dot(x, wqkv_ref[l],
                      preferred_element_type=jnp.float32) + bqkv_ref[l]
        q = qkv[:, 0 * HIDDEN:1 * HIDDEN]
        k = qkv[:, 1 * HIDDEN:2 * HIDDEN]
        v = qkv[:, 2 * HIDDEN:3 * HIDDEN]

        # --- scaled dot-product attention, all heads kept in registers ---
        heads = []
        for h in range(N_HEADS):                                  # static unroll
            c0 = h * HEAD_DIM
            qh = q[:, c0:c0 + HEAD_DIM]
            kh = k[:, c0:c0 + HEAD_DIM]
            vh = v[:, c0:c0 + HEAD_DIM]
            # q @ k^T without materializing a transpose: contract last dims.
            s = jax.lax.dot_general(qh, kh, (((1,), (1,)), ((), ())),
                                    preferred_element_type=jnp.float32) * scale
            s = s + mask                                          # broadcast over rows
            s = s - jnp.max(s, axis=-1, keepdims=True)
            pexp = jnp.exp(s)
            denom = jnp.sum(pexp, axis=-1, keepdims=True)
            pexp = pexp * pl.reciprocal(denom, approx=True)       # EUP, not VALU
            heads.append(jnp.dot(pexp, vh, preferred_element_type=jnp.float32))
        ctx = jnp.concatenate(heads, axis=1)                      # (S, H)

        # --- output projection + fused residual + LayerNorm ---
        attn_out = jnp.dot(ctx, wo_ref[l],
                           preferred_element_type=jnp.float32) + bo_ref[l]
        x = _layernorm(attn_out + x, ln1g_ref[l], ln1b_ref[l])

        # --- FFN with exact erf GELU + fused residual + LayerNorm ---
        inter = _gelu_exact(
            jnp.dot(x, wi_ref[l], preferred_element_type=jnp.float32) + bi_ref[l])
        ffn = jnp.dot(inter, wf_ref[l],
                      preferred_element_type=jnp.float32) + bf_ref[l]
        x = _layernorm(ffn + x, ln2g_ref[l], ln2b_ref[l])

    o_ref[0] = x


# ------------------------------ model glue ------------------------------

def init_params(key):
    def normal(k, shape):
        return 0.02 * jax.random.normal(k, shape, dtype=jnp.float32)

    keys = jax.random.split(key, 3 + N_LAYERS)
    wqkv, wo, wi, wf = [], [], [], []
    for l in range(N_LAYERS):
        lk = jax.random.split(keys[3 + l], 6)
        wq = normal(lk[0], (HIDDEN, HIDDEN))
        wk = normal(lk[1], (HIDDEN, HIDDEN))
        wv = normal(lk[2], (HIDDEN, HIDDEN))
        wqkv.append(jnp.concatenate([wq, wk, wv], axis=1))         # fused QKV weight
        wo.append(normal(lk[3], (HIDDEN, HIDDEN)))
        wi.append(normal(lk[4], (HIDDEN, INTER)))
        wf.append(normal(lk[5], (INTER, HIDDEN)))

    L = N_LAYERS
    return {
        "word_emb": normal(keys[0], (VOCAB, HIDDEN)),
        "pos_emb": normal(keys[1], (MAX_POS, HIDDEN)),
        "type_emb": normal(keys[2], (TYPE_VOCAB, HIDDEN)),
        "emb_ln_g": jnp.ones((1, HIDDEN), jnp.float32),
        "emb_ln_b": jnp.zeros((1, HIDDEN), jnp.float32),
        "wqkv": jnp.stack(wqkv),                                   # (L, H, 3H)
        "bqkv": jnp.zeros((L, 1, 3 * HIDDEN), jnp.float32),
        "wo": jnp.stack(wo),                                       # (L, H, H)
        "bo": jnp.zeros((L, 1, HIDDEN), jnp.float32),
        "ln1_g": jnp.ones((L, 1, HIDDEN), jnp.float32),
        "ln1_b": jnp.zeros((L, 1, HIDDEN), jnp.float32),
        "wi": jnp.stack(wi),                                       # (L, H, I)
        "bi": jnp.zeros((L, 1, INTER), jnp.float32),
        "wf": jnp.stack(wf),                                       # (L, I, H)
        "bf": jnp.zeros((L, 1, HIDDEN), jnp.float32),
        "ln2_g": jnp.ones((L, 1, HIDDEN), jnp.float32),
        "ln2_b": jnp.zeros((L, 1, HIDDEN), jnp.float32),
    }


def bert_text_encoder_forward(text, params):
    """text: (B, 3, S) stacked as [input_ids, attention_mask, token_type_ids]."""
    input_ids = text[:, 0, :].astype(jnp.int32)       # .long()
    attn_mask = text[:, 1, :].astype(jnp.float32)     # .float()
    token_type_ids = text[:, 2, :].astype(jnp.int32)  # .long()
    B, S = input_ids.shape

    # Embedding gathers are plain-JAX glue; everything after is one kernel.
    word = jnp.take(params["word_emb"], input_ids, axis=0)
    pos = params["pos_emb"][:S][None, :, :]
    typ = jnp.take(params["type_emb"], token_type_ids, axis=0)
    emb = (word + pos + typ).astype(jnp.float32)                   # (B, S, H)

    # Extended attention mask: (1 - mask) * -10000, additive over key axis.
    ext = ((1.0 - attn_mask) * -10000.0)[:, None, :]               # (B, 1, S)

    L, H, I = N_LAYERS, HIDDEN, INTER

    def full(shape):  # whole-array block, same for every grid step
        return pl.BlockSpec(shape, lambda b: (0,) * len(shape))

    out = pl.pallas_call(
        _bert_encoder_kernel,
        out_shape=jax.ShapeDtypeStruct((B, S, H), jnp.float32),
        grid=(B,),
        in_specs=[
            pl.BlockSpec((1, S, H), lambda b: (b, 0, 0)),   # embeddings (per batch)
            pl.BlockSpec((1, 1, S), lambda b: (b, 0, 0)),   # additive mask (per batch)
            full((1, H)), full((1, H)),                     # emb LN gamma / beta
            full((L, H, 3 * H)), full((L, 1, 3 * H)),       # fused QKV weight / bias
            full((L, H, H)), full((L, 1, H)),               # attn output proj
            full((L, 1, H)), full((L, 1, H)),               # LN1 gamma / beta
            full((L, H, I)), full((L, 1, I)),               # FFN intermediate
            full((L, I, H)), full((L, 1, H)),               # FFN output
            full((L, 1, H)), full((L, 1, H)),               # LN2 gamma / beta
        ],
        out_specs=pl.BlockSpec((1, S, H), lambda b: (b, 0, 0)),
        compiler_params=pltpu.CompilerParams(
            dimension_semantics=("parallel",)),              # megacore-friendly on v7x
    )(emb, ext,
      params["emb_ln_g"], params["emb_ln_b"],
      params["wqkv"], params["bqkv"], params["wo"], params["bo"],
      params["ln1_g"], params["ln1_b"],
      params["wi"], params["bi"], params["wf"], params["bf"],
      params["ln2_g"], params["ln2_b"])
    return out  # last_hidden_states (B, S, H)


if __name__ == "__main__":
    key = jax.random.PRNGKey(0)
    pkey, dkey = jax.random.split(key)
    params = init_params(pkey)

    B, S = 2, 8
    k1, _ = jax.random.split(dkey)
    input_ids = jax.random.randint(k1, (B, S), 0, VOCAB)
    lengths = jnp.array([[S], [S - 2]], dtype=jnp.int32)            # per-batch valid lengths
    attention_mask = (jnp.arange(S)[None, :] < lengths).astype(jnp.float32)
    token_type_ids = jnp.concatenate(
        [jnp.zeros((B, S // 2), jnp.int32), jnp.ones((B, S // 2), jnp.int32)], axis=1)

    # text: (B, 3, S) exactly as the PyTorch forward expects.
    text = jnp.stack(
        [input_ids.astype(jnp.float32), attention_mask, token_type_ids.astype(jnp.float32)],
        axis=1)

    out = bert_text_encoder_forward(text, params)
    out = jax.block_until_ready(out)
    assert out.shape == (B, S, HIDDEN) and out.dtype == jnp.float32
    print("KERNEL_OK")
</pallas_src>

<mosaic_0001>
module attributes {stable_mosaic.version = 11 : i64} {
  func.func @_bert_encoder_kernel(%arg0: i32, %arg1: memref<1x8x32xf32, #tpu.memory_space<vmem>>, %arg2: memref<1x1x8xf32, #tpu.memory_space<vmem>>, %arg3: memref<1x32xf32, #tpu.memory_space<vmem>>, %arg4: memref<1x32xf32, #tpu.memory_space<vmem>>, %arg5: memref<2x32x96xf32, #tpu.memory_space<vmem>>, %arg6: memref<2x1x96xf32, #tpu.memory_space<vmem>>, %arg7: memref<2x32x32xf32, #tpu.memory_space<vmem>>, %arg8: memref<2x1x32xf32, #tpu.memory_space<vmem>>, %arg9: memref<2x1x32xf32, #tpu.memory_space<vmem>>, %arg10: memref<2x1x32xf32, #tpu.memory_space<vmem>>, %arg11: memref<2x32x64xf32, #tpu.memory_space<vmem>>, %arg12: memref<2x1x64xf32, #tpu.memory_space<vmem>>, %arg13: memref<2x64x32xf32, #tpu.memory_space<vmem>>, %arg14: memref<2x1x32xf32, #tpu.memory_space<vmem>>, %arg15: memref<2x1x32xf32, #tpu.memory_space<vmem>>, %arg16: memref<2x1x32xf32, #tpu.memory_space<vmem>>, %arg17: memref<1x8x32xf32, #tpu.memory_space<vmem>>) attributes {dimension_semantics = [#tpu.dimension_semantics<parallel>], iteration_bounds = array<i64: 2>, scalar_prefetch = 0 : i64, scratch_operands = 0 : i64, tpu.core_type = #tpu.core_type<tc>, window_params = [{transform_indices = @transform_0, window_bounds = array<i64: 1, 8, 32>}, {transform_indices = @transform_1, window_bounds = array<i64: 1, 1, 8>}, {pipeline_mode = #tpu.pipeline_mode<synchronous>, transform_indices = @transform_2, window_bounds = array<i64: 1, 32>}, {pipeline_mode = #tpu.pipeline_mode<synchronous>, transform_indices = @transform_3, window_bounds = array<i64: 1, 32>}, {pipeline_mode = #tpu.pipeline_mode<synchronous>, transform_indices = @transform_4, window_bounds = array<i64: 2, 32, 96>}, {pipeline_mode = #tpu.pipeline_mode<synchronous>, transform_indices = @transform_5, window_bounds = array<i64: 2, 1, 96>}, {pipeline_mode = #tpu.pipeline_mode<synchronous>, transform_indices = @transform_6, window_bounds = array<i64: 2, 32, 32>}, {pipeline_mode = #tpu.pipeline_mode<synchronous>, transform_indices = @transform_7, window_bounds = array<i64: 2, 1, 32>}, {pipeline_mode = #tpu.pipeline_mode<synchronous>, transform_indices = @transform_8, window_bounds = array<i64: 2, 1, 32>}, {pipeline_mode = #tpu.pipeline_mode<synchronous>, transform_indices = @transform_9, window_bounds = array<i64: 2, 1, 32>}, {pipeline_mode = #tpu.pipeline_mode<synchronous>, transform_indices = @transform_10, window_bounds = array<i64: 2, 32, 64>}, {pipeline_mode = #tpu.pipeline_mode<synchronous>, transform_indices = @transform_11, window_bounds = array<i64: 2, 1, 64>}, {pipeline_mode = #tpu.pipeline_mode<synchronous>, transform_indices = @transform_12, window_bounds = array<i64: 2, 64, 32>}, {pipeline_mode = #tpu.pipeline_mode<synchronous>, transform_indices = @transform_13, window_bounds = array<i64: 2, 1, 32>}, {pipeline_mode = #tpu.pipeline_mode<synchronous>, transform_indices = @transform_14, window_bounds = array<i64: 2, 1, 32>}, {pipeline_mode = #tpu.pipeline_mode<synchronous>, transform_indices = @transform_15, window_bounds = array<i64: 2, 1, 32>}, {transform_indices = @transform_16, window_bounds = array<i64: 1, 8, 32>}]} {
    %c0 = arith.constant 0 : index
    %c0_0 = arith.constant 0 : index
    %c0_1 = arith.constant 0 : index
    %0 = vector.load %arg1[%c0, %c0_0, %c0_1] : memref<1x8x32xf32, #tpu.memory_space<vmem>>, vector<1x8x32xf32>
    %1 = vector.shape_cast %0 : vector<1x8x32xf32> to vector<8x32xf32>
    %c0_2 = arith.constant 0 : index
    %c0_3 = arith.constant 0 : index
    %2 = vector.load %arg3[%c0_2, %c0_3] : memref<1x32xf32, #tpu.memory_space<vmem>>, vector<1x32xf32>
    %c0_4 = arith.constant 0 : index
    %c0_5 = arith.constant 0 : index
    %3 = vector.load %arg4[%c0_4, %c0_5] : memref<1x32xf32, #tpu.memory_space<vmem>>, vector<1x32xf32>
    %cst = arith.constant dense<0.000000e+00> : vector<8xf32>
    %4 = vector.multi_reduction <add>, %1, %cst [1] : vector<8x32xf32> to vector<8xf32>
    %5 = vector.shape_cast %4 : vector<8xf32> to vector<8x1xf32>
    %cst_6 = arith.constant 3.200000e+01 : f32
    %6 = vector.broadcast %cst_6 : f32 to vector<8x1xf32>
    %7 = arith.divf %5, %6 : vector<8x1xf32>
    %8 = vector.broadcast %7 : vector<8x1xf32> to vector<8x32xf32>
    %9 = arith.subf %1, %8 : vector<8x32xf32>
    %10 = arith.mulf %9, %9 : vector<8x32xf32>
    %cst_7 = arith.constant dense<0.000000e+00> : vector<8xf32>
    %11 = vector.multi_reduction <add>, %10, %cst_7 [1] : vector<8x32xf32> to vector<8xf32>
    %12 = vector.shape_cast %11 : vector<8xf32> to vector<8x1xf32>
    %cst_8 = arith.constant 3.200000e+01 : f32
    %13 = vector.broadcast %cst_8 : f32 to vector<8x1xf32>
    %14 = arith.divf %12, %13 : vector<8x1xf32>
    %cst_9 = arith.constant 9.99999996E-13 : f32
    %15 = vector.broadcast %cst_9 : f32 to vector<8x1xf32>
    %16 = arith.addf %14, %15 : vector<8x1xf32>
    %17 = math.rsqrt %16 : vector<8x1xf32>
    %18 = vector.broadcast %17 : vector<8x1xf32> to vector<8x32xf32>
    %19 = arith.mulf %9, %18 : vector<8x32xf32>
    %20 = vector.broadcast %2 : vector<1x32xf32> to vector<8x32xf32>
    %21 = arith.mulf %19, %20 : vector<8x32xf32>
    %22 = vector.broadcast %3 : vector<1x32xf32> to vector<8x32xf32>
    %23 = arith.addf %21, %22 : vector<8x32xf32>
    %c0_10 = arith.constant 0 : index
    %c0_11 = arith.constant 0 : index
    %c0_12 = arith.constant 0 : index
    %24 = vector.load %arg2[%c0_10, %c0_11, %c0_12] : memref<1x1x8xf32, #tpu.memory_space<vmem>>, vector<1x1x8xf32>
    %25 = vector.shape_cast %24 : vector<1x1x8xf32> to vector<1x8xf32>
    %c0_13 = arith.constant 0 : index
    %c0_14 = arith.constant 0 : index
    %c0_15 = arith.constant 0 : index
    %26 = vector.load %arg5[%c0_13, %c0_14, %c0_15] : memref<2x32x96xf32, #tpu.memory_space<vmem>>, vector<1x32x96xf32>
    %27 = vector.shape_cast %26 : vector<1x32x96xf32> to vector<32x96xf32>
    %cst_16 = arith.constant dense<0.000000e+00> : vector<8x96xf32>
    %28 = tpu.matmul %23, %27, %cst_16 {dimension_numbers = #tpu.dot_dimension_numbers<[1], [0], [0], [1], [0, 0, 1, 1], [], []>} : vector<8x32xf32>, vector<32x96xf32>, vector<8x96xf32> -> vector<8x96xf32>
    %c0_17 = arith.constant 0 : index
    %c0_18 = arith.constant 0 : index
    %c0_19 = arith.constant 0 : index
    %29 = vector.load %arg6[%c0_17, %c0_18, %c0_19] : memref<2x1x96xf32, #tpu.memory_space<vmem>>, vector<1x1x96xf32>
    %30 = vector.shape_cast %29 : vector<1x1x96xf32> to vector<1x96xf32>
    %31 = vector.broadcast %30 : vector<1x96xf32> to vector<8x96xf32>
    %32 = arith.addf %28, %31 : vector<8x96xf32>
    %33 = vector.extract_strided_slice %32 {offsets = [0, 0], sizes = [8, 32], strides = [1, 1]} : vector<8x96xf32> to vector<8x32xf32>
    %34 = vector.extract_strided_slice %32 {offsets = [0, 32], sizes = [8, 32], strides = [1, 1]} : vector<8x96xf32> to vector<8x32xf32>
    %35 = vector.extract_strided_slice %32 {offsets = [0, 64], sizes = [8, 32], strides = [1, 1]} : vector<8x96xf32> to vector<8x32xf32>
    %36 = vector.extract_strided_slice %33 {offsets = [0, 0], sizes = [8, 16], strides = [1, 1]} : vector<8x32xf32> to vector<8x16xf32>
    %37 = vector.extract_strided_slice %34 {offsets = [0, 0], sizes = [8, 16], strides = [1, 1]} : vector<8x32xf32> to vector<8x16xf32>
    %38 = vector.extract_strided_slice %35 {offsets = [0, 0], sizes = [8, 16], strides = [1, 1]} : vector<8x32xf32> to vector<8x16xf32>
    %cst_20 = arith.constant dense<0.000000e+00> : vector<8x8xf32>
    %39 = tpu.matmul %36, %37, %cst_20 {dimension_numbers = #tpu.dot_dimension_numbers<[1], [1], [0], [0], [0, 0, 1, 0], [], []>} : vector<8x16xf32>, vector<8x16xf32>, vector<8x8xf32> -> vector<8x8xf32>
    %cst_21 = arith.constant 2.500000e-01 : f32
    %40 = vector.broadcast %cst_21 : f32 to vector<8x8xf32>
    %41 = arith.mulf %39, %40 : vector<8x8xf32>
    %42 = vector.broadcast %25 : vector<1x8xf32> to vector<8x8xf32>
    %43 = arith.addf %41, %42 : vector<8x8xf32>
    %cst_22 = arith.constant dense<0xFF800000> : vector<8xf32>
    %44 = vector.multi_reduction <maximumf>, %43, %cst_22 [1] : vector<8x8xf32> to vector<8xf32>
    %45 = vector.shape_cast %44 : vector<8xf32> to vector<8x1xf32>
    %46 = vector.broadcast %45 : vector<8x1xf32> to vector<8x8xf32>
    %47 = arith.subf %43, %46 : vector<8x8xf32>
    %48 = math.exp %47 : vector<8x8xf32>
    %cst_23 = arith.constant dense<0.000000e+00> : vector<8xf32>
    %49 = vector.multi_reduction <add>, %48, %cst_23 [1] : vector<8x8xf32> to vector<8xf32>
    %50 = vector.shape_cast %49 : vector<8xf32> to vector<8x1xf32>
    %51 = tpu.reciprocal %50 {approx = true} : vector<8x1xf32> -> vector<8x1xf32>
    %52 = vector.broadcast %51 : vector<8x1xf32> to vector<8x8xf32>
    %53 = arith.mulf %48, %52 : vector<8x8xf32>
    %cst_24 = arith.constant dense<0.000000e+00> : vector<8x16xf32>
    %54 = tpu.matmul %53, %38, %cst_24 {dimension_numbers = #tpu.dot_dimension_numbers<[1], [0], [0], [1], [0, 0, 1, 1], [], []>} : vector<8x8xf32>, vector<8x16xf32>, vector<8x16xf32> -> vector<8x16xf32>
    %55 = vector.extract_strided_slice %33 {offsets = [0, 16], sizes = [8, 16], strides = [1, 1]} : vector<8x32xf32> to vector<8x16xf32>
    %56 = vector.extract_strided_slice %34 {offsets = [0, 16], sizes = [8, 16], strides = [1, 1]} : vector<8x32xf32> to vector<8x16xf32>
    %57 = vector.extract_strided_slice %35 {offsets = [0, 16], sizes = [8, 16], strides = [1, 1]} : vector<8x32xf32> to vector<8x16xf32>
    %cst_25 = arith.constant dense<0.000000e+00> : vector<8x8xf32>
    %58 = tpu.matmul %55, %56, %cst_25 {dimension_numbers = #tpu.dot_dimension_numbers<[1], [1], [0], [0], [0, 0, 1, 0], [], []>} : vector<8x16xf32>, vector<8x16xf32>, vector<8x8xf32> -> vector<8x8xf32>
    %cst_26 = arith.constant 2.500000e-01 : f32
    %59 = vector.broadcast %cst_26 : f32 to vector<8x8xf32>
    %60 = arith.mulf %58, %59 : vector<8x8xf32>
    %61 = vector.broadcast %25 : vector<1x8xf32> to vector<8x8xf32>
    %62 = arith.addf %60, %61 : vector<8x8xf32>
    %cst_27 = arith.constant dense<0xFF800000> : vector<8xf32>
    %63 = vector.multi_reduction <maximumf>, %62, %cst_27 [1] : vector<8x8xf32> to vector<8xf32>
    %64 = vector.shape_cast %63 : vector<8xf32> to vector<8x1xf32>
    %65 = vector.broadcast %64 : vector<8x1xf32> to vector<8x8xf32>
    %66 = arith.subf %62, %65 : vector<8x8xf32>
    %67 = math.exp %66 : vector<8x8xf32>
    %cst_28 = arith.constant dense<0.000000e+00> : vector<8xf32>
    %68 = vector.multi_reduction <add>, %67, %cst_28 [1] : vector<8x8xf32> to vector<8xf32>
    %69 = vector.shape_cast %68 : vector<8xf32> to vector<8x1xf32>
    %70 = tpu.reciprocal %69 {approx = true} : vector<8x1xf32> -> vector<8x1xf32>
    %71 = vector.broadcast %70 : vector<8x1xf32> to vector<8x8xf32>
    %72 = arith.mulf %67, %71 : vector<8x8xf32>
    %cst_29 = arith.constant dense<0.000000e+00> : vector<8x16xf32>
    %73 = tpu.matmul %72, %57, %cst_29 {dimension_numbers = #tpu.dot_dimension_numbers<[1], [0], [0], [1], [0, 0, 1, 1], [], []>} : vector<8x8xf32>, vector<8x16xf32>, vector<8x16xf32> -> vector<8x16xf32>
    %74 = tpu.concatenate %54, %73 in 1 : vector<8x16xf32>, vector<8x16xf32> -> vector<8x32xf32>
    %c0_30 = arith.constant 0 : index
    %c0_31 = arith.constant 0 : index
    %c0_32 = arith.constant 0 : index
    %75 = vector.load %arg7[%c0_30, %c0_31, %c0_32] : memref<2x32x32xf32, #tpu.memory_space<vmem>>, vector<1x32x32xf32>
    %76 = vector.shape_cast %75 : vector<1x32x32xf32> to vector<32x32xf32>
    %cst_33 = arith.constant dense<0.000000e+00> : vector<8x32xf32>
    %77 = tpu.matmul %74, %76, %cst_33 {dimension_numbers = #tpu.dot_dimension_numbers<[1], [0], [0], [1], [0, 0, 1, 1], [], []>} : vector<8x32xf32>, vector<32x32xf32>, vector<8x32xf32> -> vector<8x32xf32>
    %c0_34 = arith.constant 0 : index
    %c0_35 = arith.constant 0 : index
    %c0_36 = arith.constant 0 : index
    %78 = vector.load %arg8[%c0_34, %c0_35, %c0_36] : memref<2x1x32xf32, #tpu.memory_space<vmem>>, vector<1x1x32xf32>
    %79 = vector.shape_cast %78 : vector<1x1x32xf32> to vector<1x32xf32>
    %80 = vector.broadcast %79 : vector<1x32xf32> to vector<8x32xf32>
    %81 = arith.addf %77, %80 : vector<8x32xf32>
    %82 = arith.addf %81, %23 : vector<8x32xf32>
    %c0_37 = arith.constant 0 : index
    %c0_38 = arith.constant 0 : index
    %c0_39 = arith.constant 0 : index
    %83 = vector.load %arg9[%c0_37, %c0_38, %c0_39] : memref<2x1x32xf32, #tpu.memory_space<vmem>>, vector<1x1x32xf32>
    %84 = vector.shape_cast %83 : vector<1x1x32xf32> to vector<1x32xf32>
    %c0_40 = arith.constant 0 : index
    %c0_41 = arith.constant 0 : index
    %c0_42 = arith.constant 0 : index
    %85 = vector.load %arg10[%c0_40, %c0_41, %c0_42] : memref<2x1x32xf32, #tpu.memory_space<vmem>>, vector<1x1x32xf32>
    %86 = vector.shape_cast %85 : vector<1x1x32xf32> to vector<1x32xf32>
    %cst_43 = arith.constant dense<0.000000e+00> : vector<8xf32>
    %87 = vector.multi_reduction <add>, %82, %cst_43 [1] : vector<8x32xf32> to vector<8xf32>
    %88 = vector.shape_cast %87 : vector<8xf32> to vector<8x1xf32>
    %cst_44 = arith.constant 3.200000e+01 : f32
    %89 = vector.broadcast %cst_44 : f32 to vector<8x1xf32>
    %90 = arith.divf %88, %89 : vector<8x1xf32>
    %91 = vector.broadcast %90 : vector<8x1xf32> to vector<8x32xf32>
    %92 = arith.subf %82, %91 : vector<8x32xf32>
    %93 = arith.mulf %92, %92 : vector<8x32xf32>
    %cst_45 = arith.constant dense<0.000000e+00> : vector<8xf32>
    %94 = vector.multi_reduction <add>, %93, %cst_45 [1] : vector<8x32xf32> to vector<8xf32>
    %95 = vector.shape_cast %94 : vector<8xf32> to vector<8x1xf32>
    %cst_46 = arith.constant 3.200000e+01 : f32
    %96 = vector.broadcast %cst_46 : f32 to vector<8x1xf32>
    %97 = arith.divf %95, %96 : vector<8x1xf32>
    %cst_47 = arith.constant 9.99999996E-13 : f32
    %98 = vector.broadcast %cst_47 : f32 to vector<8x1xf32>
    %99 = arith.addf %97, %98 : vector<8x1xf32>
    %100 = math.rsqrt %99 : vector<8x1xf32>
    %101 = vector.broadcast %100 : vector<8x1xf32> to vector<8x32xf32>
    %102 = arith.mulf %92, %101 : vector<8x32xf32>
    %103 = vector.broadcast %84 : vector<1x32xf32> to vector<8x32xf32>
    %104 = arith.mulf %102, %103 : vector<8x32xf32>
    %105 = vector.broadcast %86 : vector<1x32xf32> to vector<8x32xf32>
    %106 = arith.addf %104, %105 : vector<8x32xf32>
    %c0_48 = arith.constant 0 : index
    %c0_49 = arith.constant 0 : index
    %c0_50 = arith.constant 0 : index
    %107 = vector.load %arg11[%c0_48, %c0_49, %c0_50] : memref<2x32x64xf32, #tpu.memory_space<vmem>>, vector<1x32x64xf32>
    %108 = vector.shape_cast %107 : vector<1x32x64xf32> to vector<32x64xf32>
    %cst_51 = arith.constant dense<0.000000e+00> : vector<8x64xf32>
    %109 = tpu.matmul %106, %108, %cst_51 {dimension_numbers = #tpu.dot_dimension_numbers<[1], [0], [0], [1], [0, 0, 1, 1], [], []>} : vector<8x32xf32>, vector<32x64xf32>, vector<8x64xf32> -> vector<8x64xf32>
    %c0_52 = arith.constant 0 : index
    %c0_53 = arith.constant 0 : index
    %c0_54 = arith.constant 0 : index
    %110 = vector.load %arg12[%c0_52, %c0_53, %c0_54] : memref<2x1x64xf32, #tpu.memory_space<vmem>>, vector<1x1x64xf32>
    %111 = vector.shape_cast %110 : vector<1x1x64xf32> to vector<1x64xf32>
    %112 = vector.broadcast %111 : vector<1x64xf32> to vector<8x64xf32>
    %113 = arith.addf %109, %112 : vector<8x64xf32>
    %cst_55 = arith.constant 5.000000e-01 : f32
    %114 = vector.broadcast %cst_55 : f32 to vector<8x64xf32>
    %115 = arith.mulf %114, %113 : vector<8x64xf32>
    %cst_56 = arith.constant 0.707106769 : f32
    %116 = vector.broadcast %cst_56 : f32 to vector<8x64xf32>
    %117 = arith.mulf %113, %116 : vector<8x64xf32>
    %118 = math.absf %117 : vector<8x64xf32>
    %cst_57 = arith.constant 0.327591091 : f32
    %119 = vector.broadcast %cst_57 : f32 to vector<8x64xf32>
    %120 = arith.mulf %119, %118 : vector<8x64xf32>
    %cst_58 = arith.constant 1.000000e+00 : f32
    %121 = vector.broadcast %cst_58 : f32 to vector<8x64xf32>
    %122 = arith.addf %121, %120 : vector<8x64xf32>
    %cst_59 = arith.constant 1.000000e+00 : f32
    %123 = vector.broadcast %cst_59 : f32 to vector<8x64xf32>
    %124 = arith.divf %123, %122 : vector<8x64xf32>
    %cst_60 = arith.constant 1.06140542 : f32
    %125 = vector.broadcast %cst_60 : f32 to vector<8x64xf32>
    %126 = arith.mulf %124, %125 : vector<8x64xf32>
    %cst_61 = arith.constant -1.45315206 : f32
    %127 = vector.broadcast %cst_61 : f32 to vector<8x64xf32>
    %128 = arith.addf %127, %126 : vector<8x64xf32>
    %129 = arith.mulf %124, %128 : vector<8x64xf32>
    %cst_62 = arith.constant 1.42141378 : f32
    %130 = vector.broadcast %cst_62 : f32 to vector<8x64xf32>
    %131 = arith.addf %130, %129 : vector<8x64xf32>
    %132 = arith.mulf %124, %131 : vector<8x64xf32>
    %cst_63 = arith.constant -0.284496725 : f32
    %133 = vector.broadcast %cst_63 : f32 to vector<8x64xf32>
    %134 = arith.addf %133, %132 : vector<8x64xf32>
    %135 = arith.mulf %124, %134 : vector<8x64xf32>
    %cst_64 = arith.constant 0.254829586 : f32
    %136 = vector.broadcast %cst_64 : f32 to vector<8x64xf32>
    %137 = arith.addf %136, %135 : vector<8x64xf32>
    %138 = arith.mulf %124, %137 : vector<8x64xf32>
    %cst_65 = arith.constant 0.000000e+00 : f32
    %139 = vector.broadcast %cst_65 : f32 to vector<8x64xf32>
    %140 = arith.subf %139, %118 : vector<8x64xf32>
    %141 = arith.mulf %140, %118 : vector<8x64xf32>
    %142 = math.exp %141 : vector<8x64xf32>
    %143 = arith.mulf %138, %142 : vector<8x64xf32>
    %cst_66 = arith.constant 1.000000e+00 : f32
    %144 = vector.broadcast %cst_66 : f32 to vector<8x64xf32>
    %145 = arith.subf %144, %143 : vector<8x64xf32>
    %cst_67 = arith.constant 0.000000e+00 : f32
    %146 = vector.broadcast %cst_67 : f32 to vector<8x64xf32>
    %147 = arith.cmpf oge, %117, %146 : vector<8x64xf32>
    %cst_68 = arith.constant 0.000000e+00 : f32
    %148 = vector.broadcast %cst_68 : f32 to vector<8x64xf32>
    %149 = arith.subf %148, %145 : vector<8x64xf32>
    %150 = arith.select %147, %145, %149 : vector<8x64xi1>, vector<8x64xf32>
    %cst_69 = arith.constant 1.000000e+00 : f32
    %151 = vector.broadcast %cst_69 : f32 to vector<8x64xf32>
    %152 = arith.addf %151, %150 : vector<8x64xf32>
    %153 = arith.mulf %115, %152 : vector<8x64xf32>
    %c0_70 = arith.constant 0 : index
    %c0_71 = arith.constant 0 : index
    %c0_72 = arith.constant 0 : index
    %154 = vector.load %arg13[%c0_70, %c0_71, %c0_72] : memref<2x64x32xf32, #tpu.memory_space<vmem>>, vector<1x64x32xf32>
    %155 = vector.shape_cast %154 : vector<1x64x32xf32> to vector<64x32xf32>
    %cst_73 = arith.constant dense<0.000000e+00> : vector<8x32xf32>
    %156 = tpu.matmul %153, %155, %cst_73 {dimension_numbers = #tpu.dot_dimension_numbers<[1], [0], [0], [1], [0, 0, 1, 1], [], []>} : vector<8x64xf32>, vector<64x32xf32>, vector<8x32xf32> -> vector<8x32xf32>
    %c0_74 = arith.constant 0 : index
    %c0_75 = arith.constant 0 : index
    %c0_76 = arith.constant 0 : index
    %157 = vector.load %arg14[%c0_74, %c0_75, %c0_76] : memref<2x1x32xf32, #tpu.memory_space<vmem>>, vector<1x1x32xf32>
    %158 = vector.shape_cast %157 : vector<1x1x32xf32> to vector<1x32xf32>
    %159 = vector.broadcast %158 : vector<1x32xf32> to vector<8x32xf32>
    %160 = arith.addf %156, %159 : vector<8x32xf32>
    %161 = arith.addf %160, %106 : vector<8x32xf32>
    %c0_77 = arith.constant 0 : index
    %c0_78 = arith.constant 0 : index
    %c0_79 = arith.constant 0 : index
    %162 = vector.load %arg15[%c0_77, %c0_78, %c0_79] : memref<2x1x32xf32, #tpu.memory_space<vmem>>, vector<1x1x32xf32>
    %163 = vector.shape_cast %162 : vector<1x1x32xf32> to vector<1x32xf32>
    %c0_80 = arith.constant 0 : index
    %c0_81 = arith.constant 0 : index
    %c0_82 = arith.constant 0 : index
    %164 = vector.load %arg16[%c0_80, %c0_81, %c0_82] : memref<2x1x32xf32, #tpu.memory_space<vmem>>, vector<1x1x32xf32>
    %165 = vector.shape_cast %164 : vector<1x1x32xf32> to vector<1x32xf32>
    %cst_83 = arith.constant dense<0.000000e+00> : vector<8xf32>
    %166 = vector.multi_reduction <add>, %161, %cst_83 [1] : vector<8x32xf32> to vector<8xf32>
    %167 = vector.shape_cast %166 : vector<8xf32> to vector<8x1xf32>
    %cst_84 = arith.constant 3.200000e+01 : f32
    %168 = vector.broadcast %cst_84 : f32 to vector<8x1xf32>
    %169 = arith.divf %167, %168 : vector<8x1xf32>
    %170 = vector.broadcast %169 : vector<8x1xf32> to vector<8x32xf32>
    %171 = arith.subf %161, %170 : vector<8x32xf32>
    %172 = arith.mulf %171, %171 : vector<8x32xf32>
    %cst_85 = arith.constant dense<0.000000e+00> : vector<8xf32>
    %173 = vector.multi_reduction <add>, %172, %cst_85 [1] : vector<8x32xf32> to vector<8xf32>
    %174 = vector.shape_cast %173 : vector<8xf32> to vector<8x1xf32>
    %cst_86 = arith.constant 3.200000e+01 : f32
    %175 = vector.broadcast %cst_86 : f32 to vector<8x1xf32>
    %176 = arith.divf %174, %175 : vector<8x1xf32>
    %cst_87 = arith.constant 9.99999996E-13 : f32
    %177 = vector.broadcast %cst_87 : f32 to vector<8x1xf32>
    %178 = arith.addf %176, %177 : vector<8x1xf32>
    %179 = math.rsqrt %178 : vector<8x1xf32>
    %180 = vector.broadcast %179 : vector<8x1xf32> to vector<8x32xf32>
    %181 = arith.mulf %171, %180 : vector<8x32xf32>
    %182 = vector.broadcast %163 : vector<1x32xf32> to vector<8x32xf32>
    %183 = arith.mulf %181, %182 : vector<8x32xf32>
    %184 = vector.broadcast %165 : vector<1x32xf32> to vector<8x32xf32>
    %185 = arith.addf %183, %184 : vector<8x32xf32>
    %c1 = arith.constant 1 : index
    %c0_88 = arith.constant 0 : index
    %c0_89 = arith.constant 0 : index
    %186 = vector.load %arg5[%c1, %c0_88, %c0_89] : memref<2x32x96xf32, #tpu.memory_space<vmem>>, vector<1x32x96xf32>
    %187 = vector.shape_cast %186 : vector<1x32x96xf32> to vector<32x96xf32>
    %cst_90 = arith.constant dense<0.000000e+00> : vector<8x96xf32>
    %188 = tpu.matmul %185, %187, %cst_90 {dimension_numbers = #tpu.dot_dimension_numbers<[1], [0], [0], [1], [0, 0, 1, 1], [], []>} : vector<8x32xf32>, vector<32x96xf32>, vector<8x96xf32> -> vector<8x96xf32>
    %c1_91 = arith.constant 1 : index
    %c0_92 = arith.constant 0 : index
    %c0_93 = arith.constant 0 : index
    %189 = vector.load %arg6[%c1_91, %c0_92, %c0_93] : memref<2x1x96xf32, #tpu.memory_space<vmem>>, vector<1x1x96xf32>
    %190 = vector.shape_cast %189 : vector<1x1x96xf32> to vector<1x96xf32>
    %191 = vector.broadcast %190 : vector<1x96xf32> to vector<8x96xf32>
    %192 = arith.addf %188, %191 : vector<8x96xf32>
    %193 = vector.extract_strided_slice %192 {offsets = [0, 0], sizes = [8, 32], strides = [1, 1]} : vector<8x96xf32> to vector<8x32xf32>
    %194 = vector.extract_strided_slice %192 {offsets = [0, 32], sizes = [8, 32], strides = [1, 1]} : vector<8x96xf32> to vector<8x32xf32>
    %195 = vector.extract_strided_slice %192 {offsets = [0, 64], sizes = [8, 32], strides = [1, 1]} : vector<8x96xf32> to vector<8x32xf32>
    %196 = vector.extract_strided_slice %193 {offsets = [0, 0], sizes = [8, 16], strides = [1, 1]} : vector<8x32xf32> to vector<8x16xf32>
    %197 = vector.extract_strided_slice %194 {offsets = [0, 0], sizes = [8, 16], strides = [1, 1]} : vector<8x32xf32> to vector<8x16xf32>
    %198 = vector.extract_strided_slice %195 {offsets = [0, 0], sizes = [8, 16], strides = [1, 1]} : vector<8x32xf32> to vector<8x16xf32>
    %cst_94 = arith.constant dense<0.000000e+00> : vector<8x8xf32>
    %199 = tpu.matmul %196, %197, %cst_94 {dimension_numbers = #tpu.dot_dimension_numbers<[1], [1], [0], [0], [0, 0, 1, 0], [], []>} : vector<8x16xf32>, vector<8x16xf32>, vector<8x8xf32> -> vector<8x8xf32>
    %cst_95 = arith.constant 2.500000e-01 : f32
    %200 = vector.broadcast %cst_95 : f32 to vector<8x8xf32>
    %201 = arith.mulf %199, %200 : vector<8x8xf32>
    %202 = vector.broadcast %25 : vector<1x8xf32> to vector<8x8xf32>
    %203 = arith.addf %201, %202 : vector<8x8xf32>
    %cst_96 = arith.constant dense<0xFF800000> : vector<8xf32>
    %204 = vector.multi_reduction <maximumf>, %203, %cst_96 [1] : vector<8x8xf32> to vector<8xf32>
    %205 = vector.shape_cast %204 : vector<8xf32> to vector<8x1xf32>
    %206 = vector.broadcast %205 : vector<8x1xf32> to vector<8x8xf32>
    %207 = arith.subf %203, %206 : vector<8x8xf32>
    %208 = math.exp %207 : vector<8x8xf32>
    %cst_97 = arith.constant dense<0.000000e+00> : vector<8xf32>
    %209 = vector.multi_reduction <add>, %208, %cst_97 [1] : vector<8x8xf32> to vector<8xf32>
    %210 = vector.shape_cast %209 : vector<8xf32> to vector<8x1xf32>
    %211 = tpu.reciprocal %210 {approx = true} : vector<8x1xf32> -> vector<8x1xf32>
    %212 = vector.broadcast %211 : vector<8x1xf32> to vector<8x8xf32>
    %213 = arith.mulf %208, %212 : vector<8x8xf32>
    %cst_98 = arith.constant dense<0.000000e+00> : vector<8x16xf32>
    %214 = tpu.matmul %213, %198, %cst_98 {dimension_numbers = #tpu.dot_dimension_numbers<[1], [0], [0], [1], [0, 0, 1, 1], [], []>} : vector<8x8xf32>, vector<8x16xf32>, vector<8x16xf32> -> vector<8x16xf32>
    %215 = vector.extract_strided_slice %193 {offsets = [0, 16], sizes = [8, 16], strides = [1, 1]} : vector<8x32xf32> to vector<8x16xf32>
    %216 = vector.extract_strided_slice %194 {offsets = [0, 16], sizes = [8, 16], strides = [1, 1]} : vector<8x32xf32> to vector<8x16xf32>
    %217 = vector.extract_strided_slice %195 {offsets = [0, 16], sizes = [8, 16], strides = [1, 1]} : vector<8x32xf32> to vector<8x16xf32>
    %cst_99 = arith.constant dense<0.000000e+00> : vector<8x8xf32>
    %218 = tpu.matmul %215, %216, %cst_99 {dimension_numbers = #tpu.dot_dimension_numbers<[1], [1], [0], [0], [0, 0, 1, 0], [], []>} : vector<8x16xf32>, vector<8x16xf32>, vector<8x8xf32> -> vector<8x8xf32>
    %cst_100 = arith.constant 2.500000e-01 : f32
    %219 = vector.broadcast %cst_100 : f32 to vector<8x8xf32>
    %220 = arith.mulf %218, %219 : vector<8x8xf32>
    %221 = vector.broadcast %25 : vector<1x8xf32> to vector<8x8xf32>
    %222 = arith.addf %220, %221 : vector<8x8xf32>
    %cst_101 = arith.constant dense<0xFF800000> : vector<8xf32>
    %223 = vector.multi_reduction <maximumf>, %222, %cst_101 [1] : vector<8x8xf32> to vector<8xf32>
    %224 = vector.shape_cast %223 : vector<8xf32> to vector<8x1xf32>
    %225 = vector.broadcast %224 : vector<8x1xf32> to vector<8x8xf32>
    %226 = arith.subf %222, %225 : vector<8x8xf32>
    %227 = math.exp %226 : vector<8x8xf32>
    %cst_102 = arith.constant dense<0.000000e+00> : vector<8xf32>
    %228 = vector.multi_reduction <add>, %227, %cst_102 [1] : vector<8x8xf32> to vector<8xf32>
    %229 = vector.shape_cast %228 : vector<8xf32> to vector<8x1xf32>
    %230 = tpu.reciprocal %229 {approx = true} : vector<8x1xf32> -> vector<8x1xf32>
    %231 = vector.broadcast %230 : vector<8x1xf32> to vector<8x8xf32>
    %232 = arith.mulf %227, %231 : vector<8x8xf32>
    %cst_103 = arith.constant dense<0.000000e+00> : vector<8x16xf32>
    %233 = tpu.matmul %232, %217, %cst_103 {dimension_numbers = #tpu.dot_dimension_numbers<[1], [0], [0], [1], [0, 0, 1, 1], [], []>} : vector<8x8xf32>, vector<8x16xf32>, vector<8x16xf32> -> vector<8x16xf32>
    %234 = tpu.concatenate %214, %233 in 1 : vector<8x16xf32>, vector<8x16xf32> -> vector<8x32xf32>
    %c1_104 = arith.constant 1 : index
    %c0_105 = arith.constant 0 : index
    %c0_106 = arith.constant 0 : index
    %235 = vector.load %arg7[%c1_104, %c0_105, %c0_106] : memref<2x32x32xf32, #tpu.memory_space<vmem>>, vector<1x32x32xf32>
    %236 = vector.shape_cast %235 : vector<1x32x32xf32> to vector<32x32xf32>
    %cst_107 = arith.constant dense<0.000000e+00> : vector<8x32xf32>
    %237 = tpu.matmul %234, %236, %cst_107 {dimension_numbers = #tpu.dot_dimension_numbers<[1], [0], [0], [1], [0, 0, 1, 1], [], []>} : vector<8x32xf32>, vector<32x32xf32>, vector<8x32xf32> -> vector<8x32xf32>
    %c1_108 = arith.constant 1 : index
    %c0_109 = arith.constant 0 : index
    %c0_110 = arith.constant 0 : index
    %238 = vector.load %arg8[%c1_108, %c0_109, %c0_110] : memref<2x1x32xf32, #tpu.memory_space<vmem>>, vector<1x1x32xf32>
    %239 = vector.shape_cast %238 : vector<1x1x32xf32> to vector<1x32xf32>
    %240 = vector.broadcast %239 : vector<1x32xf32> to vector<8x32xf32>
    %241 = arith.addf %237, %240 : vector<8x32xf32>
    %242 = arith.addf %241, %185 : vector<8x32xf32>
    %c1_111 = arith.constant 1 : index
    %c0_112 = arith.constant 0 : index
    %c0_113 = arith.constant 0 : index
    %243 = vector.load %arg9[%c1_111, %c0_112, %c0_113] : memref<2x1x32xf32, #tpu.memory_space<vmem>>, vector<1x1x32xf32>
    %244 = vector.shape_cast %243 : vector<1x1x32xf32> to vector<1x32xf32>
    %c1_114 = arith.constant 1 : index
    %c0_115 = arith.constant 0 : index
    %c0_116 = arith.constant 0 : index
    %245 = vector.load %arg10[%c1_114, %c0_115, %c0_116] : memref<2x1x32xf32, #tpu.memory_space<vmem>>, vector<1x1x32xf32>
    %246 = vector.shape_cast %245 : vector<1x1x32xf32> to vector<1x32xf32>
    %cst_117 = arith.constant dense<0.000000e+00> : vector<8xf32>
    %247 = vector.multi_reduction <add>, %242, %cst_117 [1] : vector<8x32xf32> to vector<8xf32>
    %248 = vector.shape_cast %247 : vector<8xf32> to vector<8x1xf32>
    %cst_118 = arith.constant 3.200000e+01 : f32
    %249 = vector.broadcast %cst_118 : f32 to vector<8x1xf32>
    %250 = arith.divf %248, %249 : vector<8x1xf32>
    %251 = vector.broadcast %250 : vector<8x1xf32> to vector<8x32xf32>
    %252 = arith.subf %242, %251 : vector<8x32xf32>
    %253 = arith.mulf %252, %252 : vector<8x32xf32>
    %cst_119 = arith.constant dense<0.000000e+00> : vector<8xf32>
    %254 = vector.multi_reduction <add>, %253, %cst_119 [1] : vector<8x32xf32> to vector<8xf32>
    %255 = vector.shape_cast %254 : vector<8xf32> to vector<8x1xf32>
    %cst_120 = arith.constant 3.200000e+01 : f32
    %256 = vector.broadcast %cst_120 : f32 to vector<8x1xf32>
    %257 = arith.divf %255, %256 : vector<8x1xf32>
    %cst_121 = arith.constant 9.99999996E-13 : f32
    %258 = vector.broadcast %cst_121 : f32 to vector<8x1xf32>
    %259 = arith.addf %257, %258 : vector<8x1xf32>
    %260 = math.rsqrt %259 : vector<8x1xf32>
    %261 = vector.broadcast %260 : vector<8x1xf32> to vector<8x32xf32>
    %262 = arith.mulf %252, %261 : vector<8x32xf32>
    %263 = vector.broadcast %244 : vector<1x32xf32> to vector<8x32xf32>
    %264 = arith.mulf %262, %263 : vector<8x32xf32>
    %265 = vector.broadcast %246 : vector<1x32xf32> to vector<8x32xf32>
    %266 = arith.addf %264, %265 : vector<8x32xf32>
    %c1_122 = arith.constant 1 : index
    %c0_123 = arith.constant 0 : index
    %c0_124 = arith.constant 0 : index
    %267 = vector.load %arg11[%c1_122, %c0_123, %c0_124] : memref<2x32x64xf32, #tpu.memory_space<vmem>>, vector<1x32x64xf32>
    %268 = vector.shape_cast %267 : vector<1x32x64xf32> to vector<32x64xf32>
    %cst_125 = arith.constant dense<0.000000e+00> : vector<8x64xf32>
    %269 = tpu.matmul %266, %268, %cst_125 {dimension_numbers = #tpu.dot_dimension_numbers<[1], [0], [0], [1], [0, 0, 1, 1], [], []>} : vector<8x32xf32>, vector<32x64xf32>, vector<8x64xf32> -> vector<8x64xf32>
    %c1_126 = arith.constant 1 : index
    %c0_127 = arith.constant 0 : index
    %c0_128 = arith.constant 0 : index
    %270 = vector.load %arg12[%c1_126, %c0_127, %c0_128] : memref<2x1x64xf32, #tpu.memory_space<vmem>>, vector<1x1x64xf32>
    %271 = vector.shape_cast %270 : vector<1x1x64xf32> to vector<1x64xf32>
    %272 = vector.broadcast %271 : vector<1x64xf32> to vector<8x64xf32>
    %273 = arith.addf %269, %272 : vector<8x64xf32>
    %cst_129 = arith.constant 5.000000e-01 : f32
    %274 = vector.broadcast %cst_129 : f32 to vector<8x64xf32>
    %275 = arith.mulf %274, %273 : vector<8x64xf32>
    %cst_130 = arith.constant 0.707106769 : f32
    %276 = vector.broadcast %cst_130 : f32 to vector<8x64xf32>
    %277 = arith.mulf %273, %276 : vector<8x64xf32>
    %278 = math.absf %277 : vector<8x64xf32>
    %cst_131 = arith.constant 0.327591091 : f32
    %279 = vector.broadcast %cst_131 : f32 to vector<8x64xf32>
    %280 = arith.mulf %279, %278 : vector<8x64xf32>
    %cst_132 = arith.constant 1.000000e+00 : f32
    %281 = vector.broadcast %cst_132 : f32 to vector<8x64xf32>
    %282 = arith.addf %281, %280 : vector<8x64xf32>
    %cst_133 = arith.constant 1.000000e+00 : f32
    %283 = vector.broadcast %cst_133 : f32 to vector<8x64xf32>
    %284 = arith.divf %283, %282 : vector<8x64xf32>
    %cst_134 = arith.constant 1.06140542 : f32
    %285 = vector.broadcast %cst_134 : f32 to vector<8x64xf32>
    %286 = arith.mulf %284, %285 : vector<8x64xf32>
    %cst_135 = arith.constant -1.45315206 : f32
    %287 = vector.broadcast %cst_135 : f32 to vector<8x64xf32>
    %288 = arith.addf %287, %286 : vector<8x64xf32>
    %289 = arith.mulf %284, %288 : vector<8x64xf32>
    %cst_136 = arith.constant 1.42141378 : f32
    %290 = vector.broadcast %cst_136 : f32 to vector<8x64xf32>
    %291 = arith.addf %290, %289 : vector<8x64xf32>
    %292 = arith.mulf %284, %291 : vector<8x64xf32>
    %cst_137 = arith.constant -0.284496725 : f32
    %293 = vector.broadcast %cst_137 : f32 to vector<8x64xf32>
    %294 = arith.addf %293, %292 : vector<8x64xf32>
    %295 = arith.mulf %284, %294 : vector<8x64xf32>
    %cst_138 = arith.constant 0.254829586 : f32
    %296 = vector.broadcast %cst_138 : f32 to vector<8x64xf32>
    %297 = arith.addf %296, %295 : vector<8x64xf32>
    %298 = arith.mulf %284, %297 : vector<8x64xf32>
    %cst_139 = arith.constant 0.000000e+00 : f32
    %299 = vector.broadcast %cst_139 : f32 to vector<8x64xf32>
    %300 = arith.subf %299, %278 : vector<8x64xf32>
    %301 = arith.mulf %300, %278 : vector<8x64xf32>
    %302 = math.exp %301 : vector<8x64xf32>
    %303 = arith.mulf %298, %302 : vector<8x64xf32>
    %cst_140 = arith.constant 1.000000e+00 : f32
    %304 = vector.broadcast %cst_140 : f32 to vector<8x64xf32>
    %305 = arith.subf %304, %303 : vector<8x64xf32>
    %cst_141 = arith.constant 0.000000e+00 : f32
    %306 = vector.broadcast %cst_141 : f32 to vector<8x64xf32>
    %307 = arith.cmpf oge, %277, %306 : vector<8x64xf32>
    %cst_142 = arith.constant 0.000000e+00 : f32
    %308 = vector.broadcast %cst_142 : f32 to vector<8x64xf32>
    %309 = arith.subf %308, %305 : vector<8x64xf32>
    %310 = arith.select %307, %305, %309 : vector<8x64xi1>, vector<8x64xf32>
    %cst_143 = arith.constant 1.000000e+00 : f32
    %311 = vector.broadcast %cst_143 : f32 to vector<8x64xf32>
    %312 = arith.addf %311, %310 : vector<8x64xf32>
    %313 = arith.mulf %275, %312 : vector<8x64xf32>
    %c1_144 = arith.constant 1 : index
    %c0_145 = arith.constant 0 : index
    %c0_146 = arith.constant 0 : index
    %314 = vector.load %arg13[%c1_144, %c0_145, %c0_146] : memref<2x64x32xf32, #tpu.memory_space<vmem>>, vector<1x64x32xf32>
    %315 = vector.shape_cast %314 : vector<1x64x32xf32> to vector<64x32xf32>
    %cst_147 = arith.constant dense<0.000000e+00> : vector<8x32xf32>
    %316 = tpu.matmul %313, %315, %cst_147 {dimension_numbers = #tpu.dot_dimension_numbers<[1], [0], [0], [1], [0, 0, 1, 1], [], []>} : vector<8x64xf32>, vector<64x32xf32>, vector<8x32xf32> -> vector<8x32xf32>
    %c1_148 = arith.constant 1 : index
    %c0_149 = arith.constant 0 : index
    %c0_150 = arith.constant 0 : index
    %317 = vector.load %arg14[%c1_148, %c0_149, %c0_150] : memref<2x1x32xf32, #tpu.memory_space<vmem>>, vector<1x1x32xf32>
    %318 = vector.shape_cast %317 : vector<1x1x32xf32> to vector<1x32xf32>
    %319 = vector.broadcast %318 : vector<1x32xf32> to vector<8x32xf32>
    %320 = arith.addf %316, %319 : vector<8x32xf32>
    %321 = arith.addf %320, %266 : vector<8x32xf32>
    %c1_151 = arith.constant 1 : index
    %c0_152 = arith.constant 0 : index
    %c0_153 = arith.constant 0 : index
    %322 = vector.load %arg15[%c1_151, %c0_152, %c0_153] : memref<2x1x32xf32, #tpu.memory_space<vmem>>, vector<1x1x32xf32>
    %323 = vector.shape_cast %322 : vector<1x1x32xf32> to vector<1x32xf32>
    %c1_154 = arith.constant 1 : index
    %c0_155 = arith.constant 0 : index
    %c0_156 = arith.constant 0 : index
    %324 = vector.load %arg16[%c1_154, %c0_155, %c0_156] : memref<2x1x32xf32, #tpu.memory_space<vmem>>, vector<1x1x32xf32>
    %325 = vector.shape_cast %324 : vector<1x1x32xf32> to vector<1x32xf32>
    %cst_157 = arith.constant dense<0.000000e+00> : vector<8xf32>
    %326 = vector.multi_reduction <add>, %321, %cst_157 [1] : vector<8x32xf32> to vector<8xf32>
    %327 = vector.shape_cast %326 : vector<8xf32> to vector<8x1xf32>
    %cst_158 = arith.constant 3.200000e+01 : f32
    %328 = vector.broadcast %cst_158 : f32 to vector<8x1xf32>
    %329 = arith.divf %327, %328 : vector<8x1xf32>
    %330 = vector.broadcast %329 : vector<8x1xf32> to vector<8x32xf32>
    %331 = arith.subf %321, %330 : vector<8x32xf32>
    %332 = arith.mulf %331, %331 : vector<8x32xf32>
    %cst_159 = arith.constant dense<0.000000e+00> : vector<8xf32>
    %333 = vector.multi_reduction <add>, %332, %cst_159 [1] : vector<8x32xf32> to vector<8xf32>
    %334 = vector.shape_cast %333 : vector<8xf32> to vector<8x1xf32>
    %cst_160 = arith.constant 3.200000e+01 : f32
    %335 = vector.broadcast %cst_160 : f32 to vector<8x1xf32>
    %336 = arith.divf %334, %335 : vector<8x1xf32>
    %cst_161 = arith.constant 9.99999996E-13 : f32
    %337 = vector.broadcast %cst_161 : f32 to vector<8x1xf32>
    %338 = arith.addf %336, %337 : vector<8x1xf32>
    %339 = math.rsqrt %338 : vector<8x1xf32>
    %340 = vector.broadcast %339 : vector<8x1xf32> to vector<8x32xf32>
    %341 = arith.mulf %331, %340 : vector<8x32xf32>
    %342 = vector.broadcast %323 : vector<1x32xf32> to vector<8x32xf32>
    %343 = arith.mulf %341, %342 : vector<8x32xf32>
    %344 = vector.broadcast %325 : vector<1x32xf32> to vector<8x32xf32>
    %345 = arith.addf %343, %344 : vector<8x32xf32>
    %c0_162 = arith.constant 0 : index
    %c0_163 = arith.constant 0 : index
    %c0_164 = arith.constant 0 : index
    %346 = vector.load %arg17[%c0_162, %c0_163, %c0_164] : memref<1x8x32xf32, #tpu.memory_space<vmem>>, vector<1x8x32xf32>
    %347 = vector.shape_cast %346 : vector<1x8x32xf32> to vector<8x32xf32>
    %348 = vector.shape_cast %345 : vector<8x32xf32> to vector<1x8x32xf32>
    tpu.vector_store %arg17[%c0_162, %c0_163, %c0_164], %348 {strides = array<i32>} : memref<1x8x32xf32, #tpu.memory_space<vmem>>, vector<1x8x32xf32>,
    return
  }
  func.func @transform_0(%arg0: i32) -> (i32, i32, i32) {
    %c0_i32 = arith.constant 0 : i32
    %c0_i32_0 = arith.constant 0 : i32
    %c0_i32_1 = arith.constant 0 : i32
    return %arg0, %c0_i32, %c0_i32_0 : i32, i32, i32
  }
  func.func @transform_1(%arg0: i32) -> (i32, i32, i32) {
    %c0_i32 = arith.constant 0 : i32
    %c0_i32_0 = arith.constant 0 : i32
    %c0_i32_1 = arith.constant 0 : i32
    return %arg0, %c0_i32, %c0_i32_0 : i32, i32, i32
  }
  func.func @transform_2(%arg0: i32) -> (i32, i32) {
    %c0_i32 = arith.constant 0 : i32
    %c0_i32_0 = arith.constant 0 : i32
    %c0_i32_1 = arith.constant 0 : i32
    return %c0_i32, %c0_i32_0 : i32, i32
  }
  func.func @transform_3(%arg0: i32) -> (i32, i32) {
    %c0_i32 = arith.constant 0 : i32
    %c0_i32_0 = arith.constant 0 : i32
    %c0_i32_1 = arith.constant 0 : i32
    return %c0_i32, %c0_i32_0 : i32, i32
  }
  func.func @transform_4(%arg0: i32) -> (i32, i32, i32) {
    %c0_i32 = arith.constant 0 : i32
    %c0_i32_0 = arith.constant 0 : i32
    %c0_i32_1 = arith.constant 0 : i32
    %c0_i32_2 = arith.constant 0 : i32
    return %c0_i32, %c0_i32_0, %c0_i32_1 : i32, i32, i32
  }
  func.func @transform_5(%arg0: i32) -> (i32, i32, i32) {
    %c0_i32 = arith.constant 0 : i32
    %c0_i32_0 = arith.constant 0 : i32
    %c0_i32_1 = arith.constant 0 : i32
    %c0_i32_2 = arith.constant 0 : i32
    return %c0_i32, %c0_i32_0, %c0_i32_1 : i32, i32, i32
  }
  func.func @transform_6(%arg0: i32) -> (i32, i32, i32) {
    %c0_i32 = arith.constant 0 : i32
    %c0_i32_0 = arith.constant 0 : i32
    %c0_i32_1 = arith.constant 0 : i32
    %c0_i32_2 = arith.constant 0 : i32
    return %c0_i32, %c0_i32_0, %c0_i32_1 : i32, i32, i32
  }
  func.func @transform_7(%arg0: i32) -> (i32, i32, i32) {
    %c0_i32 = arith.constant 0 : i32
    %c0_i32_0 = arith.constant 0 : i32
    %c0_i32_1 = arith.constant 0 : i32
    %c0_i32_2 = arith.constant 0 : i32
    return %c0_i32, %c0_i32_0, %c0_i32_1 : i32, i32, i32
  }
  func.func @transform_8(%arg0: i32) -> (i32, i32, i32) {
    %c0_i32 = arith.constant 0 : i32
    %c0_i32_0 = arith.constant 0 : i32
    %c0_i32_1 = arith.constant 0 : i32
    %c0_i32_2 = arith.constant 0 : i32
    return %c0_i32, %c0_i32_0, %c0_i32_1 : i32, i32, i32
  }
  func.func @transform_9(%arg0: i32) -> (i32, i32, i32) {
    %c0_i32 = arith.constant 0 : i32
    %c0_i32_0 = arith.constant 0 : i32
    %c0_i32_1 = arith.constant 0 : i32
    %c0_i32_2 = arith.constant 0 : i32
    return %c0_i32, %c0_i32_0, %c0_i32_1 : i32, i32, i32
  }
  func.func @transform_10(%arg0: i32) -> (i32, i32, i32) {
    %c0_i32 = arith.constant 0 : i32
    %c0_i32_0 = arith.constant 0 : i32
    %c0_i32_1 = arith.constant 0 : i32
    %c0_i32_2 = arith.constant 0 : i32
    return %c0_i32, %c0_i32_0, %c0_i32_1 : i32, i32, i32
  }
  func.func @transform_11(%arg0: i32) -> (i32, i32, i32) {
    %c0_i32 = arith.constant 0 : i32
    %c0_i32_0 = arith.constant 0 : i32
    %c0_i32_1 = arith.constant 0 : i32
    %c0_i32_2 = arith.constant 0 : i32
    return %c0_i32, %c0_i32_0, %c0_i32_1 : i32, i32, i32
  }
  func.func @transform_12(%arg0: i32) -> (i32, i32, i32) {
    %c0_i32 = arith.constant 0 : i32
    %c0_i32_0 = arith.constant 0 : i32
    %c0_i32_1 = arith.constant 0 : i32
    %c0_i32_2 = arith.constant 0 : i32
    return %c0_i32, %c0_i32_0, %c0_i32_1 : i32, i32, i32
  }
  func.func @transform_13(%arg0: i32) -> (i32, i32, i32) {
    %c0_i32 = arith.constant 0 : i32
    %c0_i32_0 = arith.constant 0 : i32
    %c0_i32_1 = arith.constant 0 : i32
    %c0_i32_2 = arith.constant 0 : i32
    return %c0_i32, %c0_i32_0, %c0_i32_1 : i32, i32, i32
  }
  func.func @transform_14(%arg0: i32) -> (i32, i32, i32) {
    %c0_i32 = arith.constant 0 : i32
    %c0_i32_0 = arith.constant 0 : i32
    %c0_i32_1 = arith.constant 0 : i32
    %c0_i32_2 = arith.constant 0 : i32
    return %c0_i32, %c0_i32_0, %c0_i32_1 : i32, i32, i32
  }
  func.func @transform_15(%arg0: i32) -> (i32, i32, i32) {
    %c0_i32 = arith.constant 0 : i32
    %c0_i32_0 = arith.constant 0 : i32
    %c0_i32_1 = arith.constant 0 : i32
    %c0_i32_2 = arith.constant 0 : i32
    return %c0_i32, %c0_i32_0, %c0_i32_1 : i32, i32, i32
  }
  func.func @transform_16(%arg0: i32) -> (i32, i32, i32) {
    %c0_i32 = arith.constant 0 : i32
    %c0_i32_0 = arith.constant 0 : i32
    %c0_i32_1 = arith.constant 0 : i32
    return %arg0, %c0_i32, %c0_i32_0 : i32, i32, i32
  }
}

</mosaic_0001>

<bundles_post_ra>
// kernel: tpu_custom_call.1
= control target key start
LH: loop header
LB: loop body
LE: loop exit
PB: predicated region body
PF: predicated region fallthrough
CT: control target
= control target key end

     0   :  { %s3520_s0 = inlined_call_operand.hbm [shape: f32[2,8,32], index: 0, kind: input, shape index: {}]   ;;  %s3521_s1 = inlined_call_operand.vmem [shape: f32[2,1,8], index: 1, kind: input, shape index: {}]   ;;  %s3522_s2 = inlined_call_operand.hbm [shape: f32[1,32], index: 2, kind: input, shape index: {}]   ;;  %s3523_s3 = inlined_call_operand.hbm [shape: f32[1,32], index: 3, kind: input, shape index: {}]   ;;  %s3524_s4 = inlined_call_operand.vmem [shape: f32[2,32,96], index: 4, kind: input, shape index: {}]   ;;  %s3525_s5 = inlined_call_operand.vmem [shape: f32[2,1,96], index: 5, kind: input, shape index: {}]   ;;  %s3526_s6 = inlined_call_operand.vmem [shape: f32[2,32,32], index: 6, kind: input, shape index: {}]   ;;  %s3527_s7 = inlined_call_operand.vmem [shape: f32[2,1,32], index: 7, kind: input, shape index: {}]   ;;  %s3528_s8 = inlined_call_operand.vmem [shape: f32[2,1,32], index: 8, kind: input, shape index: {}]   ;;  %s3529_s9 = inlined_call_operand.vmem [shape: f32[2,1,32], index: 9, kind: input, shape index: {}]   ;;  %s3530_s10 = inlined_call_operand.vmem [shape: f32[2,32,64], index: 10, kind: input, shape index: {}]   ;;  %s3531_s11 = inlined_call_operand.vmem [shape: f32[2,1,64], index: 11, kind: input, shape index: {}]   ;;  %s3532_s12 = inlined_call_operand.vmem [shape: f32[2,64,32], index: 12, kind: input, shape index: {}]   ;;  %s3533_s13 = inlined_call_operand.vmem [shape: f32[2,1,32], index: 13, kind: input, shape index: {}]   ;;  %s3534_s14 = inlined_call_operand.vmem [shape: f32[2,1,32], index: 14, kind: input, shape index: {}]   ;;  %s3535_s15 = inlined_call_operand.vmem [shape: f32[2,1,32], index: 15, kind: input, shape index: {}]   ;;  %s3536_s16 = inlined_call_operand.hbm [shape: f32[2,8,32], index: 16, kind: output, shape index: {}]  }
   0x1   :  { %3552 = sst [smem:[#allocation14_spill]] %s3520_s0 }
   0x2   :  { %3553 = sst [smem:[#allocation15_spill]] %s3521_s1 }
   0x3   :  { %3554 = sst [smem:[#allocation16_spill]] %s3522_s2 }
   0x4   :  { %3555 = sst [smem:[#allocation17_spill]] %s3523_s3 }
   0x5   :  { %3556 = sst [smem:[#allocation18_spill]] %s3524_s4 }
   0x6   :  { %3557 = sst [smem:[#allocation19_spill]] %s3525_s5 }
   0x7   :  { %3558 = sst [smem:[#allocation20_spill]] %s3533_s13 }
   0x8   :  { %3559 = sst [smem:[#allocation21_spill]] %s3534_s14 }
   0x9   :  { %3560 = sst [smem:[#allocation22_spill]] %s3535_s15 }
   0xa   :  { %3561 = sst [smem:[#allocation23_spill]] %s3536_s16 }
   0xb   :  { %21 = vsyncpa [#allocation3], 0 }
   0xc   :  { %23 = vsyncpa [#allocation3 + $0x1], 0 }
   0xd   :  { %24 = vsyncpa [#allocation6], 0 }
   0xe   :  { %25 = vsyncpa [#allocation4], 0 }
   0xf   :  { %27 = vsyncpa [#allocation4 + $0x1], 0  ;;  %s2990_s21 = smov 0   ;;  %s2992_s22 = smov 0  }
  0x10   :  { %s2994_s23 = smov 0   ;;  %s2996_s24 = smov 0  }
  0x11 LB: > { %3562 = sst [smem:[#allocation12_spill]] %s2878_s21  ;;  %s3011_s25 = sadd.s32 4294967295, %s2890_s24   ;;  %s2890_s24 = sphi %s2996_s24, %s3599_s24   ;;  %s2886_s23 = sphi %s2994_s23, %s3598_s23   ;;  %s2882_s22 = sphi %s2992_s22, %s3597_s22   ;;  %s2878_s21 = sphi %s2990_s21, %s3596_s21  }
  0x12   : > { %s2273_s26 = sadd.s32 4294967294, %s2890_s24   ;;  %p53_p0 = scmp.ne.s32.totalorder %s2882_s22, %s2878_s21 }
  0x13   : > { %p3543_p1 = scmp.eq.s32.totalorder %s3011_s25, 0  ;;  %p403_p3 = scmp.eq.s32.totalorder %s2273_s26, 1 }
  0x14   : > { %p2274_p5 = scmp.ge.s32.totalorder %s2890_s24, 1  ;;  %p410_p7 = scmp.lt.s32.totalorder %s2890_s24, 3 }
  0x15   : > { %p3020_p4 = por %p3543_p1, %p53_p0  ;;  %p3025_p6 = por %p403_p3, %p53_p0 }
  0x16   : > { %p3030_p8 = pnand %p2274_p5, %p410_p7  ;;  %s2892_s30 = smov [#allocation5]  }
  0x17   : > { %s3563_s27 = scalar_select %p3020_p4, 1, 0 }
  0x18   : > { %s3564_s28 = scalar_select %p3025_p6, 1, 0 }
  0x19   : > { %s3566_s29 = scalar_select %p3030_p8, 1, 0 }
  0x1a   : > { %3565 = sst [smem:[#allocation13_spill]] %s3564_s28  ;;  %s423_s0 = sshll.u32 %s2892_s30, 4  ;;  %s424_s0 = int_to_ptr.vmem [resolvable:$true] %s423_s0 }
  0x1b   : > { %p2636_p10 = pneg %p3030_p8  ;;  %s2893_s17 = smov [#allocation7]  }
  0x1c   : > { %s434_s18 = sshll.u32 %s2893_s17, 4  ;;  %s3046_s20 = sadd.s32 1, %s2890_s24   ;;  %s3043_s18 = int_to_ptr.vmem [resolvable:$true] %s434_s18 }
  0x1d   : > { %p3039_p11 = pnand %p2636_p10, %p3543_p1  ;;  %s3568_s2 = sld [smem:[#allocation16_spill]] }
  0x1f   : > { %p2736_p13 = pneg %p3039_p11 }
  0x23   : > { %s2734_s21 = scalar_lea.hbm %s3568_s2, 16 }
  0x24   : > { %p2735_p12 = scmp.ne.s32.totalorder %s3568_s2, %s2734_s21  ;;  %p2741_p5 = scmp.lt.u32.totalorder %s2734_s21, %s3568_s2 }
  0x26   : > { %p2737_p0 = pnand %p2736_p13, %p2735_p12 }
  0x28   : > { %p2738_p3 = pneg %p2737_p0 }
  0x2a   : > { %p2743_p7 = pnand %p2741_p5, %p2738_p3 }
  0x2c   : > { %2746 = shalt.err (!%p2743_p7)
}
  0x2d   : > { %s2747_s26 = scalar_lea.vmem %s424_s0, 16  ;;  %s2754_s15 = scalar_lea.vmem %s424_s0, 32 }
  0x2e   : > { %p2748_p10 = scmp.ne.s32.totalorder %s424_s0, %s2747_s26  ;;  %p2755_p2 = scmp.lt.s32.totalorder %s424_s0, %s424_s0 }
  0x2f   : > { %p2756_p6 = scmp.lt.s32.totalorder %s2754_s15, %s2747_s26 }
  0x30   : > { %p2750_p9 = pnand %p2748_p10, %p2736_p13 }
  0x31   : > { %p2757_p4 = por %p2756_p6, %p2755_p2 }
  0x32   : > { %p2751_p1 = pneg %p2750_p9 }
  0x34   : > { %p2758_p8 = pnand %p2757_p4, %p2751_p1 }
  0x36   : > { %2761 = shalt.err (!%p2758_p8)
}
  0x37   : > { %2639 = dma.hbm_to_vmem [thread:$0]  (!%p3039_p11), %s3568_s2, 16, %s424_s0, [#allocation6]  }
  0x38   : > { %s3569_s3 = sld [smem:[#allocation17_spill]] }
  0x3e   : > { %s2762_s30 = scalar_lea.hbm %s3569_s3, 16 }
  0x3f   : > { %p2763_p9 = scmp.ne.s32.totalorder %s3569_s3, %s2762_s30  ;;  %p2769_p4 = scmp.lt.u32.totalorder %s2762_s30, %s3569_s3 }
  0x41   : > { %p2765_p2 = pnand %p2763_p9, %p2736_p13 }
  0x43   : > { %p2766_p1 = pneg %p2765_p2 }
  0x45   : > { %p2771_p6 = pnand %p2769_p4, %p2766_p1 }
  0x47   : > { %2774 = shalt.err (!%p2771_p6)
}
  0x48   : > { %s2775_s0 = scalar_lea.vmem %s3043_s18, 16  ;;  %s2782_s13 = scalar_lea.vmem %s3043_s18, 32 }
  0x49   : > { %p2776_p8 = scmp.ne.s32.totalorder %s3043_s18, %s2775_s0  ;;  %p2783_p3 = scmp.lt.s32.totalorder %s3043_s18, %s3043_s18 }
  0x4a   : > { %p2784_p5 = scmp.lt.s32.totalorder %s2782_s13, %s2775_s0 }
  0x4b   : > { %p2778_p12 = pnand %p2776_p8, %p2736_p13 }
  0x4c   : > { %p2785_p7 = por %p2784_p5, %p2783_p3 }
  0x4d   : > { %p2779_p0 = pneg %p2778_p12 }
  0x4f   : > { %p2786_p10 = pnand %p2785_p7, %p2779_p0 }
  0x51   : > { %2789 = shalt.err (!%p2786_p10)
}
  0x52   : > { %2642 = dma.hbm_to_vmem [thread:$0]  (!%p3039_p11), %s3569_s3, 16, %s3043_s18, [#allocation6]  }
  0x53   : > { %s3570_s21 = ssub.s32 %s2890_s24, %s3046_s20  ;;  %s40_s28 = sadd.s32 1, %s2886_s23 }
  0x54   : > { %p38_p13 = scmp.eq.s32.totalorder %s3570_s21, 0  ;;  %p47_p9 = scmp.ne.s32.totalorder %s2886_s23, %s2882_s22 }
  0x55   : > { %p48_p2 = scmp.eq.s32.totalorder %s2890_s24, 0  ;;  %p3571_p4 = scmp.eq.s32.totalorder %s3011_s25, 1 }
  0x56   : > { %s3106_s19 = scalar_select %p38_p13, %s2886_s23, %s40_s28  }
  0x57   : > { %p49_p1 = por %p48_p2, %p47_p9  ;;  %p3110_p6 = por %p3571_p4, %p47_p9 }
  0x58   : > { %p2653_p8 = scmp.lt.s32.totalorder %s2890_s24, 2  ;;  %s481_s17 = sand.u32 1, %s2886_s23  }
  0x59   : > { %s2278_s26 = sshll.u32 %s481_s17, 3  ;;  %s2279_s15 = sshll.u32 %s2890_s24, 7 }
  0x5a   : > { %s3573_s18 = sld [smem:[#allocation14_spill]]  ;;  %s485_s14 = scalar_lea.vmem [#allocation2], %s2278_s26 }
  0x5b   : > { %s492_s21 = sshll.u32 %s485_s14, 4  ;;  %p3124_p11 = pnand %p2653_p8, %p49_p1  ;;  %s3122_s21 = int_to_ptr.vmem [resolvable:$true] %s492_s21 }
  0x5c   : > { %s482_s2 = scalar_lea.sflag [#allocation3], %s481_s17 }
  0x5d   : > { %p2792_p0 = pneg %p3124_p11 }
  0x60   : > { %s3120_s16 = scalar_lea.hbm %s3573_s18, %s2279_s15  ;;  %s2795_s0 = scalar_lea.hbm %s3573_s18, 256 }
  0x61   : > { %s2790_s3 = scalar_lea.hbm %s3120_s16, 128  ;;  %p2796_p7 = scmp.lt.u32.totalorder %s3120_s16, %s3573_s18 }
  0x62   : > { %p2791_p12 = scmp.ne.s32.totalorder %s3120_s16, %s2790_s3  ;;  %p2797_p10 = scmp.lt.u32.totalorder %s2795_s0, %s2790_s3 }
  0x63   : > { %p2799_p9 = scmp.lt.u32.totalorder %s2790_s3, %s3120_s16 }
  0x64   : > { %p2793_p3 = pnand %p2792_p0, %p2791_p12  ;;  %p2798_p13 = por %p2797_p10, %p2796_p7 }
  0x66   : > { %p2794_p5 = pneg %p2793_p3  ;;  %p2800_p2 = por %p2799_p9, %p2798_p13 }
  0x68   : > { %p2801_p1 = pnand %p2800_p2, %p2794_p5 }
  0x6a   : > { %2804 = shalt.err (!%p2801_p1)
}
  0x6b   : > { %s2805_s17 = scalar_lea.vmem %s3122_s21, 128  ;;  %s2894_s15 = smov [#allocation2]  }
  0x6c   : > { %p2806_p4 = scmp.ne.s32.totalorder %s3122_s21, %s2805_s17  ;;  %s2810_s26 = sshll.u32 %s2894_s15, 4  ;;  %s2811_s26 = int_to_ptr.vmem [resolvable:$false] %s2810_s26 }
  0x6d   : > { %s2812_s13 = scalar_lea.vmem %s2811_s26, 256  ;;  %p2813_p3 = scmp.lt.s32.totalorder %s3122_s21, %s2811_s26 }
  0x6e   : > { %p2808_p8 = pnand %p2806_p4, %p2792_p0  ;;  %p2814_p7 = scmp.lt.s32.totalorder %s2812_s13, %s2805_s17 }
  0x70   : > { %p2809_p12 = pneg %p2808_p8  ;;  %p2815_p10 = por %p2814_p7, %p2813_p3 }
  0x72   : > { %p2816_p13 = pnand %p2815_p10, %p2809_p12 }
  0x74   : > { %2819 = shalt.err (!%p2816_p13)
}
  0x75   : > { %2646 = dma.hbm_to_vmem [thread:$0]  (!%p3124_p11), %s3120_s16, 128, %s3122_s21, %s482_s2  }
  0x76   : > { %p3575_p5 = scmp.ne.s32.totalorder %s3566_s29, 0 }
  0x77   : > { %s3156_s3 = sand.u32 (!%p3575_p5), 1, %s2882_s22   ;;  %p3576_p0 = scmp.ne.s32.totalorder (!%p3575_p5), %s3563_s27, 0 }
  0x78   : > { %507 = sbr.rel (%p3575_p5) target bundleno = 5487 (0x156f), region = 84  ;;  %s3547_s0 = sshll.u32 (!%p3575_p5), %s3156_s3, 3 }
  0x79   : > { %s510_s14 = scalar_lea.sflag (!%p3575_p5), [#allocation3], %s3156_s3  ;;  %s513_s17 = scalar_lea.vmem (!%p3575_p5), [#allocation2], %s3547_s0 }
  0x7f   : > { %2865 = dma.done.wait (%p3576_p0), %s510_s14, 128  }
  0x80   : > { %2867 = vsyncadd (%p3576_p0), %s510_s14, 4294967168  ;;  %p3577_p11 = scmp.eq.s32.totalorder %s3011_s25, 0 }
  0x82   : > { %2869 = dma.done.wait (%p3577_p11), [#allocation6], 32   ;;  %p3578_p9 = pmov %p3577_p11 }
  0x83   : > { %vm579_vm0 = vcmask 261120   ;;  %v576_v0 = vld [vmem:[%s513_s17] sm:$0xff]  ;;  %s3579_s4 = sld [smem:[#allocation18_spill]]  ;;  %v2895_v10 = vmov 0.0|0.0   ;;  %vm2896_vm1 = vmmov 0   ;;  %v2897_v13 = vmov 0.0  }
  0x84   : > { %2871 = vsyncadd (%p3578_p9), [#allocation6], 4294967264  ;;  %v580_v1 = vsel %vm579_vm0, %v576_v0, 0.0  ;;  %2564 = vmatprep.subr.bf16.mxu1 %v2895_v10  ;;  %2428 = vmatprep.mubr.msk.f32.mxu1 %vm2896_vm1, %v2897_v13  ;;  %v2285_v19 = vld [vmem:[#allocation5] ss:$0 sm:$0xff]  ;;  %s3580_s5 = sld [smem:[#allocation19_spill]] }
  0x85   : > { %581 = vadd.xlane.f32.xlu0 %v580_v1  ;;  %2441 = vmatprep.subr.mxu0 %v2897_v13  ;;  %v2286_v21 = vld [vmem:[#allocation7] ss:$0 sm:$0xff]  ;;  %s3551_s17 = smov 112   ;;  %s2899_s2 = smov 96   ;;  %vm696_vm2 = vcmask 130048   ;;  %vm779_vm3 = vcmask 64512  }
  0x86   : > { %2443 = vmatprep.mubr.msk.f32.mxu0 %vm2896_vm1, %v2897_v13  ;;  %s2900_s27 = smov 80   ;;  %p573_p2 = scmp.lt.s32.totalorder %s3011_s25, 1  ;;  %v1039_v60 = vld [vmem:[%s3526_s6] sm:$0xff]  ;;  %v1040_v61 = vld [vmem:[%s3526_s6 + $0x8] sm:$0xff]  ;;  %v1041_v62 = vld [vmem:[%s3526_s6 + $0x10] sm:$0xff]  ;;  %vm1279_vm5 = vcmask 523264  }
  0x87   : > { %s3581_s1 = sld [smem:[#allocation15_spill]]  ;;  %s3548_s15 = smov 48   ;;  %v2571_v63 = vpack.c.bf16 %v1040_v61, %v1039_v60 }
  0x88   : > { %s574_s29 = scalar_select %p573_p2, %s3011_s25, 1 }
  0x89   : > { %v609_v7 = vld [vmem:[%s3579_s4] sm:$0xff]  ;;  %v610_v8 = vld [vmem:[%s3579_s4 + $0x8] sm:$0xff]  ;;  %v611_v9 = vld [vmem:[%s3579_s4 + $0x10] sm:$0xff]  ;;  %s3550_s26 = smov 64   ;;  %s3549_s13 = smov 16  }
  0x8a   : > { %v2565_v11 = vpack.c.bf16 %v610_v8, %v609_v7  ;;  %v612_v12 = vld [vmem:[%s3579_s4 + $0x18] sm:$0xff]  ;;  %v2287_v24 = vld [vmem:[%s3580_s5] ss:$0 sm:$0xff]  ;;  %s3582_s14 = sld [smem:[#allocation20_spill]]  ;;  %s3583_s21 = sld [smem:[#allocation21_spill]] }
  0x8b   : > { %v2568_v14 = vpack.c.bf16 %v612_v12, %v611_v9  ;;  %v2296_v8 = vld [vmem:[%s3527_s7] ss:$0 sm:$0xff] }
  0x8c   : > { %2566 = vmatpush3.bf16.msra.mxu1 %v2565_v11 }
  0x8d   : > { %2567 = vmatprep.subr.bf16.mxu1 %v2895_v10  ;;  %s575_s28 = scalar_lea.vmem %s3581_s1, %s574_s29  ;;  %s3586_s29 = smov 112  }
  0x8e   : > { %v3219_v32 = vld [vmem:[%s575_s28] ss:$0 sm:$0xff]  ;;  %s3590_s28 = sshll.u32 %s3156_s3, 3 }
  0x8f   : > { %s572_s0 = scalar_lea.vmem [#allocation8], %s3590_s28 }
  0x90   : > { %2569 = vmatpush3.bf16.msra.mxu1 %v2568_v14 }
  0x91   : > { %2431 = vmatprep.subr.mxu1 %v2897_v13 }
 0x112   : > { %v582_v2 = vpop.xlane.xlu0 %581 }
 0x113   : > { %v584_v3 = vmul.f32 0.03125, %v582_v2 }
 0x115   : > { %v585_v4 = vsub.f32 %v576_v0, %v584_v3  ;;  %v1042_v0 = vld [vmem:[%s3526_s6 + $0x18] sm:$0xff] }
 0x116   : > { %v2574_v1 = vpack.c.bf16 %v1042_v0, %v1041_v62 }
 0x117   : > { %v586_v5 = vmul.f32 %v585_v4, %v585_v4 }
 0x119   : > { %v587_v6 = vsel %vm579_vm0, %v586_v5, 0.0 }
 0x11a   : > { %588 = vadd.xlane.f32.xlu0 %v587_v6 }
 0x1a7   : > { %v589_v15 = vpop.xlane.xlu0 %588 }
 0x1a8   : > { %v590_v16 = vmul.f32 0.03125, %v589_v15 }
 0x1aa   : > { %v591_v17 = vadd.f32 1e-12, %v590_v16 }
 0x1ac   : > { %2700 = vrsqrt.f32 %v591_v17 }
 0x1b6   : > { %v2701_v18 = vpop.eup %2700 }
 0x1b7   : > { %v593_v20 = vmul.f32 %v2701_v18, %v585_v4 }
 0x1b9   : > { %v600_v22 = vmul.f32 %v2285_v19, %v593_v20 }
 0x1bb   : > { %v3192_v23 = vadd.f32 %v2286_v21, %v600_v22  ;;  %v1153_v21 = vld [vmem:[%s3530_s10] sm:$0xff]  ;;  %v1154_v22 = vld [vmem:[%s3530_s10 + $0x8] sm:$0xff] }
 0x1bd   : > { %2429 = vmatmul.mubr.msk.f32.vlgmr.msra.gmra.mrb[0].mxu1 %vm579_vm0, %v3192_v23 }
 0x1be   : > { %2433 = vmatprep.mubr.msk.f32.mxu1 %vm2896_vm1, %v2897_v13 }
 0x290   : > { %v689_v25 = vpop.f32.mrb[0].mxu1 }
 0x291   : > { %v690_v26 = vadd.f32 %v2287_v24, %v689_v25  ;;  %v2430_v27 = vpop.f32.mrb[1].mxu1  ;;  %v2577_v24 = vpack.c.bf16 %v1154_v22, %v1153_v21  ;;  %v1156_v25 = vld [vmem:[%s3530_s10 + $0x18] sm:$0xff] }
 0x293   : > { %867 = vrot.lane.b32.xlu0 %v690_v26, %s3551_s17  ;;  %694 = vrot.lane.b32.xlu1 %v690_v26, %s2899_s2  ;;  %s3587_s17 = smov 64  }
 0x297   : > { %869 = vrot.lane.b32.xlu1 %v690_v26, %s2900_s27 }
 0x305   : > { %v695_v28 = vpop.permute.xlu1 %694  ;;  %v868_v30 = vpop.permute.xlu0 %867 }
 0x306   : > { %2432 = vmatpush3.xpose.msk.msra.mxu1 %vm696_vm2, %v695_v28 }
 0x307   : > { %2436 = vmatprep.subr.mxu1 %v2897_v13 }
 0x309   : > { %2434 = vmatmul.mubr.msk.f32.vlgmr.msra.gmra.mrb[2].mxu1 %vm696_vm2, %v690_v26  ;;  %v870_v29 = vpop.permute.xlu1 %869 }
 0x30a   : > { %2442 = vmatpush3.xpose.msk.msra.mxu0 %vm696_vm2, %v870_v29  ;;  %2438 = vmatprep.mubr.msk.f32.mxu1 %vm2896_vm1, %v2897_v13 }
 0x30b   : > { %2570 = vmatprep.subr.bf16.mxu0 %v2895_v10 }
 0x30d   : > { %2444 = vmatmul.mubr.msk.f32.vlgmr.msra.gmra.mrb[0].mxu0 %vm696_vm2, %v868_v30 }
 0x30e   : > { %2459 = vmatprep.mubr.msk.f32.mxu0 %vm2896_vm1, %v2897_v13  ;;  %2572 = vmatpush3.bf16.msra.mxu0 %v2571_v63 }
 0x30f   : > { %2573 = vmatprep.subr.bf16.mxu0 %v2895_v10 }
 0x312   : > { %2575 = vmatpush3.bf16.msra.mxu0 %v2574_v1 }
 0x313   : > { %2582 = vmatprep.subr.bf16.mxu0 %v2895_v10 }
 0x3dc   : > { %v767_v31 = vpop.f32.mrb[2].mxu1 }
 0x3dd   : > { %v771_v33 = vmul.f32 0.25, %v767_v31  ;;  %v2435_v34 = vpop.f32.mrb[3].mxu1  ;;  %v2298_v31 = vld [vmem:[%s3528_s8] ss:$0 sm:$0xff] }
 0x3de   : > { %v2299_v34 = vld [vmem:[%s3529_s9] ss:$0 sm:$0xff] }
 0x3df   : > { %v778_v35 = vadd.f32 %v3219_v32, %v771_v33 }
 0x3e0   : > { %v941_v36 = vpop.f32.mrb[0].mxu0 }
 0x3e1   : > { %v945_v37 = vmul.f32 0.25, %v941_v36  ;;  %v2445_v38 = vpop.f32.mrb[1].mxu0  ;;  %v780_v39 = vsel %vm779_vm3, %v778_v35, -inf }
 0x3e2   : > { %781 = vmax.xlane.f32.xlu1 %v780_v39  ;;  %v1265_v38 = vld [vmem:[%s3532_s12 + $0x8] sm:$0xff] }
 0x3e3   : > { %v946_v40 = vadd.f32 %v3219_v32, %v945_v37  ;;  %v1264_v37 = vld [vmem:[%s3532_s12] sm:$0xff] }
 0x3e4   : > { %v2583_v39 = vpack.c.bf16 %v1265_v38, %v1264_v37  ;;  %v2304_v38 = vld [vmem:[%s3583_s21] ss:$0 sm:$0xff] }
 0x3e5   : > { %v947_v41 = vsel %vm779_vm3, %v946_v40, -inf }
 0x3e6   : > { %948 = vmax.xlane.f32.xlu0 %v947_v41  ;;  %v1267_v41 = vld [vmem:[%s3532_s12 + $0x18] sm:$0xff] }
 0x3fc   : > { %958 = vrot.lane.b32.xlu0 %v690_v26, %s3548_s15  ;;  %s2175_s15 = sshll.u32 %s572_s0, 4  ;;  %s3477_s15 = int_to_ptr.vmem [resolvable:$true] %s2175_s15 }
 0x46f   : > { %v782_v42 = vpop.xlane.xlu1 %781 }
 0x470   : > { %v783_v43 = vsub.f32 %v778_v35, %v782_v42 }
 0x472   : > { %v784_v44 = vmul.f32 1.442695, %v783_v43  ;;  %v1268_v43 = vld [vmem:[%s3532_s12 + $0x20] sm:$0xff] }
 0x473   : > { %v949_v45 = vpop.xlane.xlu0 %948 }
 0x474   : > { %2702 = vpow2.f32 %v784_v44  ;;  %v950_v46 = vsub.f32 %v946_v40, %v949_v45  ;;  %v1266_v40 = vld [vmem:[%s3532_s12 + $0x10] sm:$0xff]  ;;  %v1269_v44 = vld [vmem:[%s3532_s12 + $0x28] sm:$0xff] }
 0x475   : > { %v2586_v42 = vpack.c.bf16 %v1267_v41, %v1266_v40  ;;  %v2589_v45 = vpack.c.bf16 %v1269_v44, %v1268_v43  ;;  %v2311_v43 = vld [vmem:[%s3580_s5 + $0x1] ss:$0 sm:$0xff] }
 0x476   : > { %v951_v47 = vmul.f32 1.442695, %v950_v46  ;;  %v1270_v46 = vld [vmem:[%s3532_s12 + $0x30] sm:$0xff] }
 0x477   : > { %v959_v57 = vpop.permute.xlu0 %958 }
 0x478   : > { %2704 = vpow2.f32 %v951_v47  ;;  %v1271_v47 = vld [vmem:[%s3532_s12 + $0x38] sm:$0xff] }
 0x47e   : > { %v2703_v48 = vpop.eup %2702 }
 0x47f   : > { %v786_v49 = vsel %vm779_vm3, %v2703_v48, 0.0 }
 0x480   : > { %787 = vadd.xlane.f32.xlu1 %v786_v49  ;;  %v2300_v49 = vld [vmem:[%s3531_s11] ss:$0 sm:$0xff] }
 0x482   : > { %v2705_v50 = vpop.eup %2704 }
 0x483   : > { %v953_v51 = vsel %vm779_vm3, %v2705_v50, 0.0 }
 0x484   : > { %954 = vadd.xlane.f32.xlu1 %v953_v51 }
 0x495   : > { %791 = vrot.lane.b32.xlu1 %v690_v26, %s3550_s26  ;;  %s3585_s26 = sld [smem:[#allocation22_spill]] }
 0x49b   : > { %v2305_v40 = vld [vmem:[%s3585_s26] ss:$0 sm:$0xff] }
 0x50d   : > { %v788_v52 = vpop.xlane.xlu1 %787 }
 0x50e   : > { %2706 = vrcp.f32 %v788_v52 }
 0x511   : > { %v955_v53 = vpop.xlane.xlu1 %954 }
 0x512   : > { %2708 = vrcp.f32 %v955_v53 }
 0x515   : > { %v792_v54 = vpop.permute.xlu1 %791 }
 0x516   : > { %2437 = vmatpush3.msra.mxu1 %v792_v54 }
 0x517   : > { %2446 = vmatprep.subr.mxu1 %v2897_v13 }
 0x518   : > { %v2707_v55 = vpop.eup %2706 }
 0x519   : > { %v790_v56 = vmul.f32 %v2707_v55, %v2703_v48  ;;  %v2592_v48 = vpack.c.bf16 %v1271_v47, %v1270_v46 }
 0x51b   : > { %2439 = vmatmul.mubr.msk.f32.vlgmr.msra.gmra.mrb[4].mxu1 %vm779_vm3, %v790_v56 }
 0x51c   : > { %v2709_v58 = vpop.eup %2708  ;;  %2447 = vmatpush3.msra.mxu1 %v959_v57  ;;  %2448 = vmatprep.mubr.msk.f32.mxu1 %vm2896_vm1, %v2897_v13 }
 0x51d   : > { %v957_v59 = vmul.f32 %v2709_v58, %v2705_v50  ;;  %2576 = vmatprep.subr.bf16.mxu1 %v2895_v10 }
 0x51f   : > { %2449 = vmatmul.mubr.msk.f32.vlgmr.msra.gmra.mrb[6].mxu1 %vm779_vm3, %v957_v59 }
 0x520   : > { %2470 = vmatprep.mubr.msk.f32.mxu1 %vm2896_vm1, %v2897_v13  ;;  %2578 = vmatpush3.bf16.msra.mxu1 %v2577_v24 }
 0x521   : > { %2579 = vmatprep.subr.bf16.mxu1 %v2895_v10 }
 0x5ee   : > { %v863_v2 = vpop.f32.mrb[4].mxu1 }
 0x5ef   : > { %v2440_v3 = vpop.f32.mrb[5].mxu1 }
 0x5f2   : > { %v1030_v4 = vpop.f32.mrb[6].mxu1 }
 0x5f3   : > { %1035 = vrot.lane.b32.xlu1 %v1030_v4, %s3549_s13  ;;  %v2450_v5 = vpop.f32.mrb[7].mxu1  ;;  %s3584_s13 = smov %s3583_s21  ;;  %s2353_s21 = sshll.u32 %s3011_s25, 7 }
 0x5f4   : > { %s2904_s25 = smov [#allocation8]  }
 0x665   : > { %v1036_v6 = vpop.permute.xlu1 %1035 }
 0x666   : > { %v1038_v7 = vsel %vm696_vm2, %v863_v2, %v1036_v6 }
 0x667   : > { %2460 = vmatmul.mubr.msk.f32.vlgmr.msra.gmra.mrb[2].mxu0 %vm579_vm0, %v1038_v7 }
 0x668   : > { %2489 = vmatprep.mubr.msk.f32.mxu0 %vm2896_vm1, %v2897_v13  ;;  %2584 = vmatpush3.bf16.msra.mxu0 %v2583_v39 }
 0x669   : > { %2585 = vmatprep.subr.bf16.mxu0 %v2895_v10 }
 0x66c   : > { %2587 = vmatpush3.bf16.msra.mxu0 %v2586_v42 }
 0x66d   : > { %2588 = vmatprep.subr.bf16.mxu0 %v2895_v10 }
 0x670   : > { %2590 = vmatpush3.bf16.msra.mxu0 %v2589_v45 }
 0x671   : > { %2591 = vmatprep.subr.bf16.mxu0 %v2895_v10 }
 0x674   : > { %2593 = vmatpush3.bf16.msra.mxu0 %v2592_v48 }
 0x675   : > { %2513 = vmatprep.subr.mxu0 %v2897_v13 }
 0x73a   : > { %v1119_v9 = vpop.f32.mrb[2].mxu0 }
 0x73b   : > { %v1120_v11 = vadd.f32 %v2296_v8, %v1119_v9  ;;  %v2461_v12 = vpop.f32.mrb[3].mxu0 }
 0x73d   : > { %v1123_v14 = vadd.f32 %v1120_v11, %v3192_v23  ;;  %v1155_v23 = vld [vmem:[%s3530_s10 + $0x10] sm:$0xff] }
 0x73e   : > { %v2580_v26 = vpack.c.bf16 %v1156_v25, %v1155_v23 }
 0x73f   : > { %v1126_v15 = vsel %vm579_vm0, %v1123_v14, 0.0 }
 0x740   : > { %1127 = vadd.xlane.f32.xlu1 %v1126_v15  ;;  %2581 = vmatpush3.bf16.msra.mxu1 %v2580_v26 }
 0x741   : > { %2594 = vmatprep.subr.bf16.mxu1 %v2895_v10 }
 0x7cd   : > { %v1128_v16 = vpop.xlane.xlu1 %1127 }
 0x7ce   : > { %v1129_v17 = vmul.f32 0.03125, %v1128_v16  ;;  %v2302_v16 = vld [vmem:[%s3582_s14] ss:$0 sm:$0xff] }
 0x7d0   : > { %v1130_v18 = vsub.f32 %v1123_v14, %v1129_v17 }
 0x7d2   : > { %v1131_v19 = vmul.f32 %v1130_v18, %v1130_v18 }
 0x7d4   : > { %v1132_v20 = vsel %vm579_vm0, %v1131_v19, 0.0 }
 0x7d5   : > { %1133 = vadd.xlane.f32.xlu0 %v1132_v20 }
 0x862   : > { %v1134_v27 = vpop.xlane.xlu0 %1133 }
 0x863   : > { %v1135_v28 = vmul.f32 0.03125, %v1134_v27  ;;  %v2306_v27 = vld [vmem:[%s3579_s4 + $0x20] sm:$0xff] }
 0x865   : > { %v1136_v29 = vadd.f32 1e-12, %v1135_v28  ;;  %v2307_v28 = vld [vmem:[%s3579_s4 + $0x28] sm:$0xff] }
 0x867   : > { %2710 = vrsqrt.f32 %v1136_v29  ;;  %v2595_v29 = vpack.c.bf16 %v2307_v28, %v2306_v27  ;;  %v2324_v27 = vld [vmem:[%s3527_s7 + $0x1] ss:$0 sm:$0xff] }
 0x871   : > { %v2711_v30 = vpop.eup %2710 }
 0x872   : > { %v1138_v33 = vmul.f32 %v2711_v30, %v1130_v18  ;;  %v2308_v30 = vld [vmem:[%s3579_s4 + $0x30] sm:$0xff] }
 0x874   : > { %v1145_v35 = vmul.f32 %v2298_v31, %v1138_v33  ;;  %v2309_v31 = vld [vmem:[%s3579_s4 + $0x38] sm:$0xff]  ;;  %s3591_s4 = sld [smem:[#allocation23_spill]] }
 0x875   : > { %v2598_v33 = vpack.c.bf16 %v2309_v31, %v2308_v30 }
 0x876   : > { %v1152_v36 = vadd.f32 %v2299_v34, %v1145_v35 }
 0x878   : > { %2471 = vmatmul.mubr.msk.f32.vlgmr.msra.gmra.mrb[8].mxu1 %vm579_vm0, %v1152_v36 }
 0x879   : > { %2500 = vmatprep.mubr.msk.f32.mxu1 %vm2896_vm1, %v2897_v13  ;;  %2596 = vmatpush3.bf16.msra.mxu1 %v2595_v29 }
 0x87a   : > { %2597 = vmatprep.subr.bf16.mxu1 %v2895_v10  ;;  %s3475_s5 = scalar_lea.hbm %s3591_s4, %s2353_s21 }
 0x87d   : > { %2599 = vmatpush3.bf16.msra.mxu1 %v2598_v33 }
 0x87e   : > { %2503 = vmatprep.subr.mxu1 %v2897_v13 }
 0x94b   : > { %v1233_v50 = vpop.f32.mrb[8].mxu1 }
 0x94c   : > { %v1234_v51 = vadd.f32 %v2300_v49, %v1233_v50  ;;  %v2472_v52 = vpop.f32.mrb[9].mxu1 }
 0x94e   : > { %v1238_v53 = vmul.f32 0.70710677, %v1234_v51  ;;  %v1237_v12 = vmul.f32 0.5, %v1234_v51 }
 0x950   : > { %v1239_v54 = vand.u32 2147483647, %v1238_v53  ;;  %vm1259_vm4 = vcmp.ge.f32.partialorder %v1238_v53, 0.0 }
 0x952   : > { %v1240_v55 = vmul.f32 0.3275911, %v1239_v54  ;;  %v1253_v57 = vsub.f32 0.0, %v1239_v54 }
 0x954   : > { %v1241_v56 = vadd.f32 1.0, %v1240_v55  ;;  %v1254_v59 = vmul.f32 %v1253_v57, %v1239_v54 }
 0x956   : > { %2712 = vrcp.f32 %v1241_v56  ;;  %v1255_v62 = vmul.f32 1.442695, %v1254_v59 }
 0x958   : > { %2714 = vpow2.f32 %v1255_v62 }
 0x960   : > { %v2713_v58 = vpop.eup %2712 }
 0x961   : > { %v1244_v60 = vmul.f32 1.0614054, %v2713_v58 }
 0x962   : > { %v2715_v6 = vpop.eup %2714 }
 0x963   : > { %v1245_v61 = vadd.f32 -1.4531521, %v1244_v60 }
 0x965   : > { %v1246_v63 = vmul.f32 %v2713_v58, %v1245_v61 }
 0x967   : > { %v1247_v0 = vadd.f32 1.4214138, %v1246_v63 }
 0x969   : > { %v1248_v1 = vmul.f32 %v2713_v58, %v1247_v0 }
 0x96b   : > { %v1249_v2 = vadd.f32 -0.28449672, %v1248_v1 }
 0x96d   : > { %v1250_v3 = vmul.f32 %v2713_v58, %v1249_v2 }
 0x96f   : > { %v1251_v4 = vadd.f32 0.2548296, %v1250_v3 }
 0x971   : > { %v1252_v5 = vmul.f32 %v2713_v58, %v1251_v4 }
 0x973   : > { %v1257_v7 = vmul.f32 %v2715_v6, %v1252_v5 }
 0x975   : > { %v1258_v8 = vsub.f32 1.0, %v1257_v7 }
 0x977   : > { %v1260_v9 = vsub.f32 0.0, %v1258_v8 }
 0x979   : > { %v1261_v11 = vsel %vm1259_vm4, %v1258_v8, %v1260_v9 }
 0x97a   : > { %v1262_v14 = vadd.f32 1.0, %v1261_v11 }
 0x97c   : > { %v1263_v15 = vmul.f32 %v1262_v14, %v1237_v12 }
 0x97e   : > { %2490 = vmatmul.mubr.msk.f32.vlgmr.msra.gmra.mrb[4].mxu0 %vm1279_vm5, %v1263_v15  ;;  %v2319_v15 = vld [vmem:[%s3526_s6 + $0x20] sm:$0xff] }
 0x97f   : > { %2515 = vmatprep.mubr.msk.f32.mxu0 %vm2896_vm1, %v2897_v13 }
 0xa51   : > { %v1349_v17 = vpop.f32.mrb[4].mxu0 }
 0xa52   : > { %v1350_v18 = vadd.f32 %v2302_v16, %v1349_v17  ;;  %v2491_v19 = vpop.f32.mrb[5].mxu0  ;;  %v2320_v16 = vld [vmem:[%s3526_s6 + $0x28] sm:$0xff]  ;;  %v2321_v17 = vld [vmem:[%s3526_s6 + $0x30] sm:$0xff] }
 0xa53   : > { %v2322_v19 = vld [vmem:[%s3526_s6 + $0x38] sm:$0xff] }
 0xa54   : > { %v1353_v20 = vadd.f32 %v1350_v18, %v1152_v36  ;;  %v2601_v18 = vpack.c.bf16 %v2320_v16, %v2319_v15 }
 0xa56   : > { %v1356_v21 = vsel %vm579_vm0, %v1353_v20, 0.0 }
 0xa57   : > { %1357 = vadd.xlane.f32.xlu1 %v1356_v21 }
 0xae4   : > { %v1358_v22 = vpop.xlane.xlu1 %1357 }
 0xae5   : > { %v1359_v24 = vmul.f32 0.03125, %v1358_v22 }
 0xae7   : > { %v1360_v23 = vsub.f32 %v1353_v20, %v1359_v24  ;;  %v2604_v20 = vpack.c.bf16 %v2322_v19, %v2321_v17 }
 0xae9   : > { %v1361_v25 = vmul.f32 %v1360_v23, %v1360_v23 }
 0xaeb   : > { %v1362_v26 = vsel %vm579_vm0, %v1361_v25, 0.0 }
 0xaec   : > { %1363 = vadd.xlane.f32.xlu1 %v1362_v26 }
 0xb79   : > { %v1364_v34 = vpop.xlane.xlu1 %1363 }
 0xb7a   : > { %v1365_v35 = vmul.f32 0.03125, %v1364_v34 }
 0xb7c   : > { %v1366_v36 = vadd.f32 1e-12, %v1365_v35 }
 0xb7e   : > { %2716 = vrsqrt.f32 %v1366_v36 }
 0xb88   : > { %v2717_v37 = vpop.eup %2716 }
 0xb89   : > { %v1368_v39 = vmul.f32 %v2717_v37, %v1360_v23 }
 0xb8b   : > { %v1375_v41 = vmul.f32 %v2304_v38, %v1368_v39  ;;  %v2331_v39 = vld [vmem:[%s3530_s10 + $0x28] sm:$0xff] }
 0xb8d   : > { %v3344_v42 = vadd.f32 %v2305_v40, %v1375_v41  ;;  %v2332_v41 = vld [vmem:[%s3530_s10 + $0x30] sm:$0xff] }
 0xb8f   : > { %2501 = vmatmul.mubr.msk.f32.vlgmr.msra.gmra.mrb[10].mxu1 %vm579_vm0, %v3344_v42 }
 0xb90   : > { %2505 = vmatprep.mubr.msk.f32.mxu1 %vm2896_vm1, %v2897_v13 }
 0xc62   : > { %v1465_v44 = vpop.f32.mrb[10].mxu1 }
 0xc63   : > { %v1466_v45 = vadd.f32 %v2311_v43, %v1465_v44  ;;  %v2502_v46 = vpop.f32.mrb[11].mxu1 }
 0xc65   : > { %1637 = vrot.lane.b32.xlu1 %v1466_v45, %s2900_s27  ;;  %1470 = vrot.lane.b32.xlu0 %v1466_v45, %s2899_s2  ;;  %s3588_s2 = smov 48   ;;  %s2824_s27 = sshll.u32 %s2904_s25, 4  ;;  %s2825_s27 = int_to_ptr.vmem [resolvable:$false] %s2824_s27 }
 0xc66   : > { %s2826_s16 = scalar_lea.vmem %s2825_s27, 256  ;;  %p2827_p12 = scmp.lt.s32.totalorder %s3477_s15, %s2825_s27 }
 0xc69   : > { %1635 = vrot.lane.b32.xlu1 %v1466_v45, %s3586_s29 }
 0xcd7   : > { %v1638_v47 = vpop.permute.xlu1 %1637  ;;  %v1471_v48 = vpop.permute.xlu0 %1470 }
 0xcd8   : > { %2504 = vmatpush3.xpose.msk.msra.mxu1 %vm696_vm2, %v1471_v48  ;;  %2514 = vmatpush3.xpose.msk.msra.mxu0 %vm696_vm2, %v1638_v47  ;;  %v2328_v48 = vld [vmem:[%s3528_s8 + $0x1] ss:$0 sm:$0xff] }
 0xcd9   : > { %2508 = vmatprep.subr.mxu1 %v2897_v13  ;;  %2600 = vmatprep.subr.bf16.mxu0 %v2895_v10 }
 0xcdb   : > { %v1636_v49 = vpop.permute.xlu1 %1635  ;;  %2506 = vmatmul.mubr.msk.f32.vlgmr.msra.gmra.mrb[12].mxu1 %vm696_vm2, %v1466_v45 }
 0xcdc   : > { %2516 = vmatmul.mubr.msk.f32.vlgmr.msra.gmra.mrb[6].mxu0 %vm696_vm2, %v1636_v49  ;;  %2510 = vmatprep.mubr.msk.f32.mxu1 %vm2896_vm1, %v2897_v13 }
 0xcdd   : > { %2531 = vmatprep.mubr.msk.f32.mxu0 %vm2896_vm1, %v2897_v13  ;;  %2602 = vmatpush3.bf16.msra.mxu0 %v2601_v18 }
 0xcde   : > { %2603 = vmatprep.subr.bf16.mxu0 %v2895_v10 }
 0xce1   : > { %2605 = vmatpush3.bf16.msra.mxu0 %v2604_v20 }
 0xce2   : > { %2612 = vmatprep.subr.bf16.mxu0 %v2895_v10 }
 0xdae   : > { %v1542_v50 = vpop.f32.mrb[12].mxu1 }
 0xdaf   : > { %v1546_v51 = vmul.f32 0.25, %v1542_v50  ;;  %v2507_v52 = vpop.f32.mrb[13].mxu1  ;;  %v1709_v53 = vpop.f32.mrb[6].mxu0  ;;  %v2329_v50 = vld [vmem:[%s3529_s9 + $0x1] ss:$0 sm:$0xff] }
 0xdb0   : > { %v1713_v54 = vmul.f32 0.25, %v1709_v53  ;;  %v2517_v55 = vpop.f32.mrb[7].mxu0  ;;  %v2337_v53 = vld [vmem:[%s3532_s12 + $0x40] sm:$0xff] }
 0xdb1   : > { %v1547_v56 = vadd.f32 %v3219_v32, %v1546_v51 }
 0xdb2   : > { %v1714_v57 = vadd.f32 %v3219_v32, %v1713_v54  ;;  %v2338_v54 = vld [vmem:[%s3532_s12 + $0x48] sm:$0xff] }
 0xdb3   : > { %v1548_v58 = vsel %vm779_vm3, %v1547_v56, -inf  ;;  %v2613_v55 = vpack.c.bf16 %v2338_v54, %v2337_v53 }
 0xdb4   : > { %1549 = vmax.xlane.f32.xlu0 %v1548_v58  ;;  %v1715_v59 = vsel %vm779_vm3, %v1714_v57, -inf }
 0xdb5   : > { %1716 = vmax.xlane.f32.xlu1 %v1715_v59  ;;  %v2341_v59 = vld [vmem:[%s3532_s12 + $0x60] sm:$0xff] }
 0xdc6   : > { %1559 = vrot.lane.b32.xlu1 %v1466_v45, %s3587_s17  ;;  %s2162_s17 = scalar_lea.sflag [#allocation4], %s3156_s3 }
 0xe41   : > { %v1550_v60 = vpop.xlane.xlu0 %1549 }
 0xe42   : > { %v1551_v61 = vsub.f32 %v1547_v56, %v1550_v60  ;;  %v1717_v62 = vpop.xlane.xlu1 %1716  ;;  %v2339_v56 = vld [vmem:[%s3532_s12 + $0x50] sm:$0xff]  ;;  %v2342_v60 = vld [vmem:[%s3532_s12 + $0x68] sm:$0xff] }
 0xe43   : > { %v1718_v63 = vsub.f32 %v1714_v57, %v1717_v62  ;;  %v2340_v57 = vld [vmem:[%s3532_s12 + $0x58] sm:$0xff]  ;;  %v2343_v62 = vld [vmem:[%s3532_s12 + $0x70] sm:$0xff] }
 0xe44   : > { %v1552_v0 = vmul.f32 1.442695, %v1551_v61  ;;  %v2616_v58 = vpack.c.bf16 %v2340_v57, %v2339_v56  ;;  %v2619_v61 = vpack.c.bf16 %v2342_v60, %v2341_v59 }
 0xe45   : > { %v1719_v1 = vmul.f32 1.442695, %v1718_v63  ;;  %v2344_v63 = vld [vmem:[%s3532_s12 + $0x78] sm:$0xff] }
 0xe46   : > { %2718 = vpow2.f32 %v1552_v0  ;;  %v1560_v2 = vpop.permute.xlu1 %1559  ;;  %v2622_v0 = vpack.c.bf16 %v2344_v63, %v2343_v62 }
 0xe47   : > { %2509 = vmatpush3.msra.mxu1 %v1560_v2  ;;  %2720 = vpow2.f32 %v1719_v1  ;;  %v2335_v1 = vld [vmem:[%s3531_s11 + $0x1] ss:$0 sm:$0xff] }
 0xe48   : > { %2518 = vmatprep.subr.mxu1 %v2897_v13 }
 0xe50   : > { %v2719_v32 = vpop.eup %2718 }
 0xe51   : > { %v1554_v3 = vsel %vm779_vm3, %v2719_v32, 0.0  ;;  %v2721_v4 = vpop.eup %2720 }
 0xe52   : > { %1555 = vadd.xlane.f32.xlu0 %v1554_v3  ;;  %v1721_v5 = vsel %vm779_vm3, %v2721_v4, 0.0 }
 0xe56   : > { %1722 = vadd.xlane.f32.xlu0 %v1721_v5 }
 0xe6c   : > { %1726 = vrot.lane.b32.xlu0 %v1466_v45, %s3588_s2  ;;  %s3589_s2 = smov 16  }
 0xedf   : > { %v1556_v6 = vpop.xlane.xlu0 %1555 }
 0xee0   : > { %2722 = vrcp.f32 %v1556_v6 }
 0xee3   : > { %v1723_v7 = vpop.xlane.xlu0 %1722 }
 0xee4   : > { %2724 = vrcp.f32 %v1723_v7 }
 0xee7   : > { %v1727_v11 = vpop.permute.xlu0 %1726 }
 0xeea   : > { %v2723_v8 = vpop.eup %2722 }
 0xeeb   : > { %v1558_v9 = vmul.f32 %v2723_v8, %v2719_v32 }
 0xeed   : > { %2511 = vmatmul.mubr.msk.f32.vlgmr.msra.gmra.mrb[14].mxu1 %vm779_vm3, %v1558_v9 }
 0xeee   : > { %v2725_v12 = vpop.eup %2724  ;;  %2519 = vmatpush3.msra.mxu1 %v1727_v11  ;;  %2520 = vmatprep.mubr.msk.f32.mxu1 %vm2896_vm1, %v2897_v13 }
 0xeef   : > { %v1725_v14 = vmul.f32 %v2725_v12, %v2721_v4  ;;  %2606 = vmatprep.subr.bf16.mxu1 %v2895_v10 }
 0xef1   : > { %2521 = vmatmul.mubr.msk.f32.vlgmr.msra.gmra.mrb[16].mxu1 %vm779_vm3, %v1725_v14 }
 0xef2   : > { %2542 = vmatprep.mubr.msk.f32.mxu1 %vm2896_vm1, %v2897_v13 }
 0xfc0   : > { %v1631_v21 = vpop.f32.mrb[14].mxu1 }
 0xfc1   : > { %v2512_v22 = vpop.f32.mrb[15].mxu1 }
 0xfc4   : > { %v1798_v24 = vpop.f32.mrb[16].mxu1 }
 0xfc5   : > { %1803 = vrot.lane.b32.xlu1 %v1798_v24, %s3589_s2  ;;  %v2522_v23 = vpop.f32.mrb[17].mxu1  ;;  %s2820_s2 = scalar_lea.vmem %s3477_s15, 128 }
 0xfc6   : > { %p2821_p1 = scmp.ne.s32.totalorder %s3477_s15, %s2820_s2  ;;  %p2828_p3 = scmp.lt.s32.totalorder %s2826_s16, %s2820_s2 }
 0xfc8   : > { %p2822_p4 = pnand %p2821_p1, %p3110_p6  ;;  %p2829_p7 = por %p2828_p3, %p2827_p12 }
 0xfca   : > { %p2823_p8 = pneg %p2822_p4 }
 0xfcc   : > { %p2830_p10 = pnand %p2829_p7, %p2823_p8 }
0x1037   : > { %v1804_v25 = vpop.permute.xlu1 %1803 }
0x1038   : > { %v1806_v26 = vsel %vm696_vm2, %v1631_v21, %v1804_v25 }
0x1039   : > { %2532 = vmatmul.mubr.msk.f32.vlgmr.msra.gmra.mrb[8].mxu0 %vm579_vm0, %v1806_v26 }
0x103a   : > { %2561 = vmatprep.mubr.msk.f32.mxu0 %vm2896_vm1, %v2897_v13  ;;  %v2330_v13 = vld [vmem:[%s3530_s10 + $0x20] sm:$0xff]  ;;  %2614 = vmatpush3.bf16.msra.mxu0 %v2613_v55 }
0x103b   : > { %v2607_v40 = vpack.c.bf16 %v2331_v39, %v2330_v13  ;;  %2615 = vmatprep.subr.bf16.mxu0 %v2895_v10 }
0x103d   : > { %2608 = vmatpush3.bf16.msra.mxu1 %v2607_v40 }
0x103e   : > { %2609 = vmatprep.subr.bf16.mxu1 %v2895_v10  ;;  %2617 = vmatpush3.bf16.msra.mxu0 %v2616_v58 }
0x103f   : > { %2618 = vmatprep.subr.bf16.mxu0 %v2895_v10 }
0x1042   : > { %2620 = vmatpush3.bf16.msra.mxu0 %v2619_v61 }
0x1043   : > { %2621 = vmatprep.subr.bf16.mxu0 %v2895_v10 }
0x1046   : > { %2623 = vmatpush3.bf16.msra.mxu0 %v2622_v0 }
0x110c   : > { %v1889_v28 = vpop.f32.mrb[8].mxu0 }
0x110d   : > { %v1890_v29 = vadd.f32 %v2324_v27, %v1889_v28  ;;  %v2533_v30 = vpop.f32.mrb[9].mxu0 }
0x110e   : > { %v2346_v30 = vld [vmem:[%s3582_s14 + $0x1] ss:$0 sm:$0xff] }
0x110f   : > { %v1893_v31 = vadd.f32 %v1890_v29, %v3344_v42  ;;  %v2333_v42 = vld [vmem:[%s3530_s10 + $0x38] sm:$0xff] }
0x1110   : > { %v2610_v43 = vpack.c.bf16 %v2333_v42, %v2332_v41 }
0x1111   : > { %v1898_v33 = vsel %vm579_vm0, %v1893_v31, 0.0 }
0x1112   : > { %1899 = vadd.xlane.f32.xlu1 %v1898_v33  ;;  %2611 = vmatpush3.bf16.msra.mxu1 %v2610_v43 }
0x119f   : > { %v1900_v34 = vpop.xlane.xlu1 %1899 }
0x11a0   : > { %v1901_v35 = vmul.f32 0.03125, %v1900_v34 }
0x11a2   : > { %v1902_v36 = vsub.f32 %v1893_v31, %v1901_v35 }
0x11a4   : > { %v1903_v37 = vmul.f32 %v1902_v36, %v1902_v36 }
0x11a6   : > { %v1904_v38 = vsel %vm579_vm0, %v1903_v37, 0.0 }
0x11a7   : > { %1905 = vadd.xlane.f32.xlu0 %v1904_v38 }
0x1234   : > { %v1906_v44 = vpop.xlane.xlu0 %1905 }
0x1235   : > { %v1907_v45 = vmul.f32 0.03125, %v1906_v44 }
0x1237   : > { %v1908_v46 = vadd.f32 1e-12, %v1907_v45  ;;  %v2350_v45 = vld [vmem:[%s3584_s13 + $0x1] ss:$0 sm:$0xff] }
0x1239   : > { %2726 = vrsqrt.f32 %v1908_v46 }
0x1243   : > { %v2727_v47 = vpop.eup %2726 }
0x1244   : > { %v1910_v49 = vmul.f32 %v2727_v47, %v1902_v36  ;;  %v2351_v47 = vld [vmem:[%s3585_s26 + $0x1] ss:$0 sm:$0xff] }
0x1246   : > { %v1917_v51 = vmul.f32 %v2328_v48, %v1910_v49 }
0x1248   : > { %v1924_v52 = vadd.f32 %v2329_v50, %v1917_v51 }
0x124a   : > { %2543 = vmatmul.mubr.msk.f32.vlgmr.msra.gmra.mrb[18].mxu1 %vm579_vm0, %v1924_v52 }
0x131d   : > { %v2007_v2 = vpop.f32.mrb[18].mxu1 }
0x131e   : > { %v2008_v32 = vadd.f32 %v2335_v1, %v2007_v2  ;;  %v2544_v3 = vpop.f32.mrb[19].mxu1 }
0x1320   : > { %v2012_v4 = vmul.f32 0.70710677, %v2008_v32  ;;  %v2011_v27 = vmul.f32 0.5, %v2008_v32 }
0x1322   : > { %v2013_v5 = vand.u32 2147483647, %v2012_v4  ;;  %vm2033_vm6 = vcmp.ge.f32.partialorder %v2012_v4, 0.0 }
0x1324   : > { %v2014_v10 = vmul.f32 0.3275911, %v2013_v5  ;;  %v2027_v7 = vsub.f32 0.0, %v2013_v5 }
0x1326   : > { %v2015_v6 = vadd.f32 1.0, %v2014_v10  ;;  %v2028_v9 = vmul.f32 %v2027_v7, %v2013_v5 }
0x1328   : > { %2728 = vrcp.f32 %v2015_v6  ;;  %v2029_v14 = vmul.f32 1.442695, %v2028_v9 }
0x132a   : > { %2730 = vpow2.f32 %v2029_v14 }
0x1332   : > { %v2729_v8 = vpop.eup %2728 }
0x1333   : > { %v2018_v11 = vmul.f32 1.0614054, %v2729_v8 }
0x1334   : > { %v2731_v22 = vpop.eup %2730 }
0x1335   : > { %v2019_v12 = vadd.f32 -1.4531521, %v2018_v11 }
0x1337   : > { %v2020_v15 = vmul.f32 %v2729_v8, %v2019_v12 }
0x1339   : > { %v2021_v16 = vadd.f32 1.4214138, %v2020_v15 }
0x133b   : > { %v2022_v17 = vmul.f32 %v2729_v8, %v2021_v16 }
0x133d   : > { %v2023_v18 = vadd.f32 -0.28449672, %v2022_v17 }
0x133f   : > { %v2024_v19 = vmul.f32 %v2729_v8, %v2023_v18 }
0x1341   : > { %v2025_v20 = vadd.f32 0.2548296, %v2024_v19 }
0x1343   : > { %v2026_v21 = vmul.f32 %v2729_v8, %v2025_v20 }
0x1345   : > { %v2031_v24 = vmul.f32 %v2731_v22, %v2026_v21 }
0x1347   : > { %v2032_v23 = vsub.f32 1.0, %v2031_v24 }
0x1349   : > { %v2034_v25 = vsub.f32 0.0, %v2032_v23 }
0x134b   : > { %v2035_v26 = vsel %vm2033_vm6, %v2032_v23, %v2034_v25 }
0x134c   : > { %v2036_v28 = vadd.f32 1.0, %v2035_v26 }
0x134e   : > { %v2037_v29 = vmul.f32 %v2036_v28, %v2011_v27 }
0x1350   : > { %2562 = vmatmul.mubr.msk.f32.vlgmr.msra.gmra.mrb[10].mxu0 %vm1279_vm5, %v2037_v29 }
0x1423   : > { %v2124_v31 = vpop.f32.mrb[10].mxu0 }
0x1424   : > { %v2125_v33 = vadd.f32 %v2346_v30, %v2124_v31  ;;  %v2563_v34 = vpop.f32.mrb[11].mxu0 }
0x1426   : > { %v2128_v35 = vadd.f32 %v2125_v33, %v1924_v52 }
0x1428   : > { %v2133_v36 = vsel %vm579_vm0, %v2128_v35, 0.0 }
0x1429   : > { %2134 = vadd.xlane.f32.xlu0 %v2133_v36 }
0x14b6   : > { %v2135_v37 = vpop.xlane.xlu0 %2134 }
0x14b7   : > { %v2136_v38 = vmul.f32 0.03125, %v2135_v37 }
0x14b9   : > { %v2137_v13 = vsub.f32 %v2128_v35, %v2136_v38 }
0x14bb   : > { %v2138_v39 = vmul.f32 %v2137_v13, %v2137_v13 }
0x14bd   : > { %v2139_v40 = vsel %vm579_vm0, %v2138_v39, 0.0 }
0x14be   : > { %2140 = vadd.xlane.f32.xlu1 %v2139_v40 }
0x154b   : > { %v2141_v41 = vpop.xlane.xlu1 %2140 }
0x154c   : > { %v2142_v42 = vmul.f32 0.03125, %v2141_v41 }
0x154e   : > { %v2143_v43 = vadd.f32 1e-12, %v2142_v42 }
0x1550   : > { %2732 = vrsqrt.f32 %v2143_v43 }
0x155a   : > { %v2733_v44 = vpop.eup %2732 }
0x155b   : > { %v2145_v46 = vmul.f32 %v2733_v44, %v2137_v13 }
0x155d   : > { %v2152_v48 = vmul.f32 %v2350_v45, %v2145_v46 }
0x155f   : > { %v2159_v49 = vadd.f32 %v2351_v47, %v2152_v48 }
0x1561   : > { %2160 = vst.msk [vmem:[%s572_s0] sm:$0xff] %vm579_vm0, %v2159_v49 }
0x1562   : > { %2833 = shalt.err (!%p2830_p10)
}
0x1563   : > { %s2834_s1 = scalar_lea.hbm %s3475_s5, 128  ;;  %s2838_s28 = scalar_lea.hbm %s3591_s4, 256 }
0x1564   : > { %p2835_p13 = scmp.ne.s32.totalorder %s3475_s5, %s2834_s1  ;;  %p2839_p11 = scmp.lt.u32.totalorder %s3475_s5, %s3591_s4 }
0x1565   : > { %p2840_p9 = scmp.lt.u32.totalorder %s2838_s28, %s2834_s1  ;;  %p2842_p1 = scmp.lt.u32.totalorder %s2834_s1, %s3475_s5 }
0x1566   : > { %p2836_p5 = pnand %p2835_p13, %p3110_p6 }
0x1567   : > { %p2841_p2 = por %p2840_p9, %p2839_p11 }
0x1568   : > { %p2837_p0 = pneg %p2836_p5 }
0x1569   : > { %p2843_p4 = por %p2842_p1, %p2841_p2 }
0x156b   : > { %p2844_p8 = pnand %p2843_p4, %p2837_p0 }
0x156d   : > { %2847 = shalt.err (!%p2844_p8)
}
0x156e   : > { %2634 = dma.vmem_to_hbm [thread:$0]  (%p3110_p6), %s3477_s15, 128, %s3475_s5, %s2162_s17  }
0x156f PF: > { %s3592_s2 = sld [smem:[#allocation12_spill]]  ;;  %s3593_s25 = sld [smem:[#allocation13_spill]] }
0x1570   : > { %p3595_p3 = scmp.ge.s32.totalorder %s2890_s24, 2 }
0x1575   : > { %s2187_s27 = sand.u32 1, %s3592_s2   ;;  %p3594_p12 = scmp.ne.s32.totalorder %s3593_s25, 0 }
0x1576   : > { %s2188_s16 = scalar_lea.sflag [#allocation4], %s2187_s27 }
0x1577   : > { %p2648_p7 = pnand %p3595_p3, %p3594_p12 }
0x1579   : > { %2873 = dma.done.wait (!%p2648_p7), %s2188_s16, 128  }
0x157a   : > { %2875 = vsyncadd (!%p2648_p7), %s2188_s16, 4294967168  ;;  %p30_p10 = scmp.ge.s32.totalorder %s3046_s20, 4   ;;  %s3596_s21 = smov %s2882_s22 }
0x157b   : > { %s3597_s22 = smov %s2886_s23  ;;  %s3598_s23 = smov %s3106_s19 }
0x157c   : > { %s3599_s24 = smov %s3046_s20  ;;  %32 = sbr.rel (!%p30_p10) target bundleno = 17 (0x11), region = 152 }
0x1583   :  { %2193 = vsyncpa [#allocation3], 1 }
0x1584   :  { %2195 = vsyncpa [#allocation3 + $0x1], 1 }
0x1585   :  { %2196 = vsyncpa [#allocation6], 1 }
0x1586   :  { %2197 = vsyncpa [#allocation4], 1 }
0x1587   :  { %2199 = vsyncpa [#allocation4 + $0x1], 1 }

</bundles_post_ra>
